<compile_context>
chip_gen: v7x
topology: tpu7x:2x2x1
jax: 0.10.0
libtpu: 0.0.40
codegen_flags: <defaults>
</compile_context>

<pallas_src>
import numpy as np
import jax
import jax.numpy as jnp
from jax import lax
from jax.experimental import pallas as pl
from jax.experimental.pallas import tpu as pltpu

# ----------------------------- problem sizes --------------------------------
N, C, H, W = 2, 4, 16, 16          # batch, channels, spatial (PyTorch NCHW x)
K = 3                              # kernel_size
DILATIONS = (1, 2, 3, 4)           # dilation tuple passed to the module
NB = len(DILATIONS)                # number of branches
STRIDE = 1                         # stride must be 1 for the residual add
BN_EPS = 1e-5

NC = N * C                         # 8   -> sublane dimension
HW = H * W                         # 256 -> lane dimension (2 x 128 lanes)
KK = K * K                         # 9 taps
SK = KK * NC                       # 72  -> stacked contraction depth
NPAR = 5                           # sc1, sh1, sc2, sh2, b2 per branch


# ------------------------------- Pallas kernel -------------------------------
def resblock4_kernel(x_ref, par_ref, mask_ref, w_ref, o_ref):
    """All 4 dilated branches + residual add, fully inside one kernel.

    x_ref    : (NC, HW)          input planes, row r = image r//C, channel r%C
    par_ref  : (NC, NB*NPAR)     packed per-row params, col b*5+{sc1,sh1,sc2,sh2,b2}
    mask_ref : (NB*KK, HW)       precomputed 0/1 edge-validity mask per (branch, tap)
    w_ref    : (NB, 2, NC, SK)   stacked block-diag conv weights, layer 0 / 1
    o_ref    : (NC, HW)          output planes
    """
    x = x_ref[...]                                          # 2 vregs, fully dense
    acc = x                                                 # residual term

    for b, d in enumerate(DILATIONS):
        base = b * NPAR
        sc1 = par_ref[:, base + 0:base + 1]                 # (NC, 1) lane-broadcast
        sh1 = par_ref[:, base + 1:base + 2]
        sc2 = par_ref[:, base + 2:base + 3]
        sh2 = par_ref[:, base + 3:base + 4]
        bias2 = par_ref[:, base + 4:base + 5]

        # Load this branch's 8 non-centre tap masks once; shared by both convs.
        m = {}
        for kh in range(K):
            for kw in range(K):
                if (kh, kw) != (1, 1):
                    t = kh * K + kw
                    i = b * KK + t
                    m[t] = mask_ref[i:i + 1, :]             # (1, HW) sublane-bcast

        def dilated_conv(a, layer, b=b, d=d, m=m):
            """'same' 3x3 conv with dilation d on the flattened (NC, HW) planes.

            Each tap is a lane rotation (XLU, otherwise idle) of the plane by
            the flat offset (kh-1)*d*W + (kw-1)*d, times its precomputed edge
            mask.  The 9 taps are stacked along sublanes into (SK, HW) and the
            whole conv is ONE (NC, SK) x (SK, HW) MXU dot with f32 accumulation.
            """
            planes = []
            for kh in range(K):
                for kw in range(K):
                    off = (kh - 1) * d * W + (kw - 1) * d
                    if off == 0:
                        planes.append(a)                    # centre tap, no shift/mask
                    else:
                        s = pltpu.roll(a, (-off) % HW, axis=1)
                        planes.append(s * m[kh * K + kw])
            s_stacked = jnp.concatenate(planes, axis=0)     # (SK, HW)
            return jnp.dot(w_ref[b, layer], s_stacked,
                           preferred_element_type=jnp.float32)

        # BN1 (folded, per-row scale/shift) + ReLU
        a1 = jnp.maximum(x * sc1 + sh1, 0.0)
        c1 = dilated_conv(a1, 0)                            # conv1, no bias
        # BN2 + ReLU
        a2 = jnp.maximum(c1 * sc2 + sh2, 0.0)
        c2 = dilated_conv(a2, 1) + bias2                    # conv2 + bias

        acc = acc + c2

    o_ref[...] = acc


# ------------------------- static (data-independent) masks -------------------
def _build_tap_masks():
    """0/1 edge-validity masks per (branch, tap); shape (NB*KK, HW)."""
    pos = np.arange(HW)
    hh, ww = pos // W, pos % W
    masks = np.zeros((NB * KK, HW), np.float32)
    for b, d in enumerate(DILATIONS):
        for kh in range(K):
            for kw in range(K):
                hs = hh + (kh - 1) * d
                ws = ww + (kw - 1) * d
                ok = (hs >= 0) & (hs < H) & (ws >= 0) & (ws < W)
                masks[b * KK + kh * K + kw] = ok.astype(np.float32)
    return masks


TAP_MASKS = jnp.asarray(_build_tap_masks())                 # (36, 256), ~36 KB


# --------------------------------- wrapper -----------------------------------
@jax.jit
def resblock4_pallas(x_nchw, sc1, sh1, w1, sc2, sh2, w2, b2):
    # NCHW -> channel-major lane-dense (N*C, H*W).  Pure reshape, no transpose.
    x = x_nchw.reshape(NC, HW).astype(jnp.float32)

    # Per-(n, c)-row folded BN scale/shift and conv2 bias packed into ONE
    # lane-dense (NC, NB*NPAR) slab: column b*5 + {sc1, sh1, sc2, sh2, b2},
    # row r -> channel r % C.
    cols = []
    for b in range(NB):
        for p in (sc1, sh1, sc2, sh2, b2):
            cols.append(jnp.tile(p[b], (N,)))               # (NC,)
    par = jnp.stack(cols, axis=1).astype(jnp.float32)       # (NC, 20)

    # Stacked, block-diagonal-over-batch weights, one (NC, SK) matrix per
    # (branch, layer):
    #   Wst[b, l, n*C+co, (kh*K+kw)*NC + n*C+ci] = w_l[b, kh, kw, ci, co]
    eye_n = jnp.eye(N, dtype=jnp.float32)

    def stack_w(w):                                          # (NB,K,K,Cin,Cout) HWIO
        wt = jnp.swapaxes(w, -1, -2)                         # (NB,K,K,Cout,Cin)
        bd = jax.vmap(jax.vmap(jax.vmap(
            lambda mm: jnp.kron(eye_n, mm))))(wt)            # (NB,K,K,NC,NC)
        bd = bd.reshape(NB, KK, NC, NC)
        return jnp.transpose(bd, (0, 2, 1, 3)).reshape(NB, NC, SK)

    w_all = jnp.stack([stack_w(w1), stack_w(w2)], axis=1)    # (NB, 2, NC, SK)
    w_all = w_all.astype(jnp.float32)

    # Advisory cost estimate for XLA's scheduler (overhead-dominated call).
    flops = 2 * NC * SK * HW * (2 * NB) + 16 * NC * HW * NB
    bytes_accessed = 4 * (2 * NC * HW + par.size + TAP_MASKS.size + w_all.size)

    out = pl.pallas_call(
        resblock4_kernel,
        out_shape=jax.ShapeDtypeStruct((NC, HW), jnp.float32),
        in_specs=[pl.BlockSpec(memory_space=pltpu.MemorySpace.VMEM)] * 4,
        out_specs=pl.BlockSpec(memory_space=pltpu.MemorySpace.VMEM),
        cost_estimate=pl.CostEstimate(flops=int(flops), transcendentals=0,
                                      bytes_accessed=int(bytes_accessed)),
    )(x, par, TAP_MASKS, w_all)

    # Lane-dense planes -> NCHW.  Again a pure reshape.
    return out.reshape(N, C, H, W)


# ----------------------------- pure-JAX reference ----------------------------
def resblock4_reference(x_nchw, sc1, sh1, w1, sc2, sh2, w2, b2):
    x = jnp.transpose(x_nchw, (0, 2, 3, 1)).astype(jnp.float32)  # NHWC
    dn = ('NHWC', 'HWIO', 'NHWC')
    acc = x
    for b, d in enumerate(DILATIONS):
        a1 = jnp.maximum(x * sc1[b][None, None, None, :] + sh1[b][None, None, None, :], 0.0)
        c1 = lax.conv_general_dilated(a1, w1[b], window_strides=(STRIDE, STRIDE),
                                      padding=[(d, d), (d, d)], rhs_dilation=(d, d),
                                      dimension_numbers=dn,
                                      precision=lax.Precision.HIGHEST)
        a2 = jnp.maximum(c1 * sc2[b][None, None, None, :] + sh2[b][None, None, None, :], 0.0)
        c2 = lax.conv_general_dilated(a2, w2[b], window_strides=(STRIDE, STRIDE),
                                      padding=[(d, d), (d, d)], rhs_dilation=(d, d),
                                      dimension_numbers=dn,
                                      precision=lax.Precision.HIGHEST)
        acc = acc + c2 + b2[b][None, None, None, :]
    return jnp.transpose(acc, (0, 3, 1, 2))


# ------------------------------ parameter setup ------------------------------
def make_params(key):
    """Deterministic synthetic parameters for the 4 branches.
    BatchNorm (eval mode) is folded into per-channel scale/shift."""
    ks = jax.random.split(key, 14)

    def fold_bn(kg, kb, km, kv):
        gamma = jax.random.uniform(kg, (NB, C), minval=0.5, maxval=1.5)
        beta = 0.1 * jax.random.normal(kb, (NB, C))
        rmean = 0.1 * jax.random.normal(km, (NB, C))
        rvar = jax.random.uniform(kv, (NB, C), minval=0.5, maxval=1.5)
        scale = gamma / jnp.sqrt(rvar + BN_EPS)
        shift = beta - rmean * scale
        return scale.astype(jnp.float32), shift.astype(jnp.float32)

    sc1, sh1 = fold_bn(ks[0], ks[1], ks[2], ks[3])
    sc2, sh2 = fold_bn(ks[4], ks[5], ks[6], ks[7])
    w1 = (0.1 * jax.random.normal(ks[8], (NB, K, K, C, C))).astype(jnp.float32)   # HWIO
    w2 = (0.1 * jax.random.normal(ks[9], (NB, K, K, C, C))).astype(jnp.float32)   # HWIO
    b2 = (0.1 * jax.random.normal(ks[10], (NB, C))).astype(jnp.float32)
    return sc1, sh1, w1, sc2, sh2, w2, b2


# ----------------------------------- main ------------------------------------
if __name__ == "__main__":
    key = jax.random.PRNGKey(0)
    kx, kp = jax.random.split(key)
    x = jax.random.normal(kx, (N, C, H, W), dtype=jnp.float32)   # PyTorch NCHW input

    params = make_params(kp)

    out = resblock4_pallas(x, *params)
    out = jax.block_until_ready(out)

    ref = jax.block_until_ready(resblock4_reference(x, *params))

    assert out.shape == (N, C, H, W), out.shape
    assert jnp.allclose(out, ref, atol=1e-3, rtol=1e-3), (
        float(jnp.max(jnp.abs(out - ref))))

    print("KERNEL_OK")
</pallas_src>

<mosaic_0001>
module attributes {stable_mosaic.version = 11 : i64} {
  func.func @resblock4_kernel(%arg0: memref<8x256xf32, #tpu.memory_space<vmem>>, %arg1: memref<8x20xf32, #tpu.memory_space<vmem>>, %arg2: memref<36x256xf32, #tpu.memory_space<vmem>>, %arg3: memref<4x2x8x72xf32, #tpu.memory_space<vmem>>, %arg4: memref<8x256xf32, #tpu.memory_space<vmem>>) attributes {dimension_semantics = [], scalar_prefetch = 0 : i64, scratch_operands = 0 : i64, tpu.core_type = #tpu.core_type<tc>} {
    %c0 = arith.constant 0 : index
    %c0_0 = arith.constant 0 : index
    %0 = vector.load %arg0[%c0, %c0_0] : memref<8x256xf32, #tpu.memory_space<vmem>>, vector<8x256xf32>
    %c0_1 = arith.constant 0 : index
    %c0_2 = arith.constant 0 : index
    %1 = vector.load %arg1[%c0_1, %c0_2] : memref<8x20xf32, #tpu.memory_space<vmem>>, vector<8x1xf32>
    %c0_3 = arith.constant 0 : index
    %c1 = arith.constant 1 : index
    %2 = vector.load %arg1[%c0_3, %c1] : memref<8x20xf32, #tpu.memory_space<vmem>>, vector<8x1xf32>
    %c0_4 = arith.constant 0 : index
    %c2 = arith.constant 2 : index
    %3 = vector.load %arg1[%c0_4, %c2] : memref<8x20xf32, #tpu.memory_space<vmem>>, vector<8x1xf32>
    %c0_5 = arith.constant 0 : index
    %c3 = arith.constant 3 : index
    %4 = vector.load %arg1[%c0_5, %c3] : memref<8x20xf32, #tpu.memory_space<vmem>>, vector<8x1xf32>
    %c0_6 = arith.constant 0 : index
    %c4 = arith.constant 4 : index
    %5 = vector.load %arg1[%c0_6, %c4] : memref<8x20xf32, #tpu.memory_space<vmem>>, vector<8x1xf32>
    %c0_7 = arith.constant 0 : index
    %c0_8 = arith.constant 0 : index
    %6 = vector.load %arg2[%c0_7, %c0_8] : memref<36x256xf32, #tpu.memory_space<vmem>>, vector<1x256xf32>
    %c1_9 = arith.constant 1 : index
    %c0_10 = arith.constant 0 : index
    %7 = vector.load %arg2[%c1_9, %c0_10] : memref<36x256xf32, #tpu.memory_space<vmem>>, vector<1x256xf32>
    %c2_11 = arith.constant 2 : index
    %c0_12 = arith.constant 0 : index
    %8 = vector.load %arg2[%c2_11, %c0_12] : memref<36x256xf32, #tpu.memory_space<vmem>>, vector<1x256xf32>
    %c3_13 = arith.constant 3 : index
    %c0_14 = arith.constant 0 : index
    %9 = vector.load %arg2[%c3_13, %c0_14] : memref<36x256xf32, #tpu.memory_space<vmem>>, vector<1x256xf32>
    %c5 = arith.constant 5 : index
    %c0_15 = arith.constant 0 : index
    %10 = vector.load %arg2[%c5, %c0_15] : memref<36x256xf32, #tpu.memory_space<vmem>>, vector<1x256xf32>
    %c6 = arith.constant 6 : index
    %c0_16 = arith.constant 0 : index
    %11 = vector.load %arg2[%c6, %c0_16] : memref<36x256xf32, #tpu.memory_space<vmem>>, vector<1x256xf32>
    %c7 = arith.constant 7 : index
    %c0_17 = arith.constant 0 : index
    %12 = vector.load %arg2[%c7, %c0_17] : memref<36x256xf32, #tpu.memory_space<vmem>>, vector<1x256xf32>
    %c8 = arith.constant 8 : index
    %c0_18 = arith.constant 0 : index
    %13 = vector.load %arg2[%c8, %c0_18] : memref<36x256xf32, #tpu.memory_space<vmem>>, vector<1x256xf32>
    %14 = vector.broadcast %1 : vector<8x1xf32> to vector<8x256xf32>
    %15 = arith.mulf %0, %14 : vector<8x256xf32>
    %16 = vector.broadcast %2 : vector<8x1xf32> to vector<8x256xf32>
    %17 = arith.addf %15, %16 : vector<8x256xf32>
    %cst = arith.constant 0.000000e+00 : f32
    %18 = vector.broadcast %cst : f32 to vector<8x256xf32>
    %19 = arith.maximumf %17, %18 : vector<8x256xf32>
    %c17_i32 = arith.constant 17 : i32
    %20 = tpu.dynamic_rotate %19 by %c17_i32 dim 1 : vector<8x256xf32>, i32 -> vector<8x256xf32>
    %21 = vector.broadcast %6 : vector<1x256xf32> to vector<8x256xf32>
    %22 = arith.mulf %20, %21 : vector<8x256xf32>
    %c16_i32 = arith.constant 16 : i32
    %23 = tpu.dynamic_rotate %19 by %c16_i32 dim 1 : vector<8x256xf32>, i32 -> vector<8x256xf32>
    %24 = vector.broadcast %7 : vector<1x256xf32> to vector<8x256xf32>
    %25 = arith.mulf %23, %24 : vector<8x256xf32>
    %c15_i32 = arith.constant 15 : i32
    %26 = tpu.dynamic_rotate %19 by %c15_i32 dim 1 : vector<8x256xf32>, i32 -> vector<8x256xf32>
    %27 = vector.broadcast %8 : vector<1x256xf32> to vector<8x256xf32>
    %28 = arith.mulf %26, %27 : vector<8x256xf32>
    %c1_i32 = arith.constant 1 : i32
    %29 = tpu.dynamic_rotate %19 by %c1_i32 dim 1 : vector<8x256xf32>, i32 -> vector<8x256xf32>
    %30 = vector.broadcast %9 : vector<1x256xf32> to vector<8x256xf32>
    %31 = arith.mulf %29, %30 : vector<8x256xf32>
    %c255_i32 = arith.constant 255 : i32
    %32 = tpu.dynamic_rotate %19 by %c255_i32 dim 1 : vector<8x256xf32>, i32 -> vector<8x256xf32>
    %33 = vector.broadcast %10 : vector<1x256xf32> to vector<8x256xf32>
    %34 = arith.mulf %32, %33 : vector<8x256xf32>
    %c241_i32 = arith.constant 241 : i32
    %35 = tpu.dynamic_rotate %19 by %c241_i32 dim 1 : vector<8x256xf32>, i32 -> vector<8x256xf32>
    %36 = vector.broadcast %11 : vector<1x256xf32> to vector<8x256xf32>
    %37 = arith.mulf %35, %36 : vector<8x256xf32>
    %c240_i32 = arith.constant 240 : i32
    %38 = tpu.dynamic_rotate %19 by %c240_i32 dim 1 : vector<8x256xf32>, i32 -> vector<8x256xf32>
    %39 = vector.broadcast %12 : vector<1x256xf32> to vector<8x256xf32>
    %40 = arith.mulf %38, %39 : vector<8x256xf32>
    %c239_i32 = arith.constant 239 : i32
    %41 = tpu.dynamic_rotate %19 by %c239_i32 dim 1 : vector<8x256xf32>, i32 -> vector<8x256xf32>
    %42 = vector.broadcast %13 : vector<1x256xf32> to vector<8x256xf32>
    %43 = arith.mulf %41, %42 : vector<8x256xf32>
    %44 = tpu.concatenate %22, %25, %28, %31, %19, %34, %37, %40, %43 in 0 : vector<8x256xf32>, vector<8x256xf32>, vector<8x256xf32>, vector<8x256xf32>, vector<8x256xf32>, vector<8x256xf32>, vector<8x256xf32>, vector<8x256xf32>, vector<8x256xf32> -> vector<72x256xf32>
    %c0_19 = arith.constant 0 : index
    %c0_20 = arith.constant 0 : index
    %c0_21 = arith.constant 0 : index
    %c0_22 = arith.constant 0 : index
    %45 = vector.load %arg3[%c0_19, %c0_20, %c0_21, %c0_22] : memref<4x2x8x72xf32, #tpu.memory_space<vmem>>, vector<1x1x8x72xf32>
    %46 = vector.shape_cast %45 : vector<1x1x8x72xf32> to vector<8x72xf32>
    %cst_23 = arith.constant dense<0.000000e+00> : vector<8x256xf32>
    %47 = tpu.matmul %46, %44, %cst_23 {dimension_numbers = #tpu.dot_dimension_numbers<[1], [0], [0], [1], [0, 0, 1, 1], [], []>} : vector<8x72xf32>, vector<72x256xf32>, vector<8x256xf32> -> vector<8x256xf32>
    %48 = vector.broadcast %3 : vector<8x1xf32> to vector<8x256xf32>
    %49 = arith.mulf %47, %48 : vector<8x256xf32>
    %50 = vector.broadcast %4 : vector<8x1xf32> to vector<8x256xf32>
    %51 = arith.addf %49, %50 : vector<8x256xf32>
    %cst_24 = arith.constant 0.000000e+00 : f32
    %52 = vector.broadcast %cst_24 : f32 to vector<8x256xf32>
    %53 = arith.maximumf %51, %52 : vector<8x256xf32>
    %c17_i32_25 = arith.constant 17 : i32
    %54 = tpu.dynamic_rotate %53 by %c17_i32_25 dim 1 : vector<8x256xf32>, i32 -> vector<8x256xf32>
    %55 = vector.broadcast %6 : vector<1x256xf32> to vector<8x256xf32>
    %56 = arith.mulf %54, %55 : vector<8x256xf32>
    %c16_i32_26 = arith.constant 16 : i32
    %57 = tpu.dynamic_rotate %53 by %c16_i32_26 dim 1 : vector<8x256xf32>, i32 -> vector<8x256xf32>
    %58 = vector.broadcast %7 : vector<1x256xf32> to vector<8x256xf32>
    %59 = arith.mulf %57, %58 : vector<8x256xf32>
    %c15_i32_27 = arith.constant 15 : i32
    %60 = tpu.dynamic_rotate %53 by %c15_i32_27 dim 1 : vector<8x256xf32>, i32 -> vector<8x256xf32>
    %61 = vector.broadcast %8 : vector<1x256xf32> to vector<8x256xf32>
    %62 = arith.mulf %60, %61 : vector<8x256xf32>
    %c1_i32_28 = arith.constant 1 : i32
    %63 = tpu.dynamic_rotate %53 by %c1_i32_28 dim 1 : vector<8x256xf32>, i32 -> vector<8x256xf32>
    %64 = vector.broadcast %9 : vector<1x256xf32> to vector<8x256xf32>
    %65 = arith.mulf %63, %64 : vector<8x256xf32>
    %c255_i32_29 = arith.constant 255 : i32
    %66 = tpu.dynamic_rotate %53 by %c255_i32_29 dim 1 : vector<8x256xf32>, i32 -> vector<8x256xf32>
    %67 = vector.broadcast %10 : vector<1x256xf32> to vector<8x256xf32>
    %68 = arith.mulf %66, %67 : vector<8x256xf32>
    %c241_i32_30 = arith.constant 241 : i32
    %69 = tpu.dynamic_rotate %53 by %c241_i32_30 dim 1 : vector<8x256xf32>, i32 -> vector<8x256xf32>
    %70 = vector.broadcast %11 : vector<1x256xf32> to vector<8x256xf32>
    %71 = arith.mulf %69, %70 : vector<8x256xf32>
    %c240_i32_31 = arith.constant 240 : i32
    %72 = tpu.dynamic_rotate %53 by %c240_i32_31 dim 1 : vector<8x256xf32>, i32 -> vector<8x256xf32>
    %73 = vector.broadcast %12 : vector<1x256xf32> to vector<8x256xf32>
    %74 = arith.mulf %72, %73 : vector<8x256xf32>
    %c239_i32_32 = arith.constant 239 : i32
    %75 = tpu.dynamic_rotate %53 by %c239_i32_32 dim 1 : vector<8x256xf32>, i32 -> vector<8x256xf32>
    %76 = vector.broadcast %13 : vector<1x256xf32> to vector<8x256xf32>
    %77 = arith.mulf %75, %76 : vector<8x256xf32>
    %78 = tpu.concatenate %56, %59, %62, %65, %53, %68, %71, %74, %77 in 0 : vector<8x256xf32>, vector<8x256xf32>, vector<8x256xf32>, vector<8x256xf32>, vector<8x256xf32>, vector<8x256xf32>, vector<8x256xf32>, vector<8x256xf32>, vector<8x256xf32> -> vector<72x256xf32>
    %c0_33 = arith.constant 0 : index
    %c1_34 = arith.constant 1 : index
    %c0_35 = arith.constant 0 : index
    %c0_36 = arith.constant 0 : index
    %79 = vector.load %arg3[%c0_33, %c1_34, %c0_35, %c0_36] : memref<4x2x8x72xf32, #tpu.memory_space<vmem>>, vector<1x1x8x72xf32>
    %80 = vector.shape_cast %79 : vector<1x1x8x72xf32> to vector<8x72xf32>
    %cst_37 = arith.constant dense<0.000000e+00> : vector<8x256xf32>
    %81 = tpu.matmul %80, %78, %cst_37 {dimension_numbers = #tpu.dot_dimension_numbers<[1], [0], [0], [1], [0, 0, 1, 1], [], []>} : vector<8x72xf32>, vector<72x256xf32>, vector<8x256xf32> -> vector<8x256xf32>
    %82 = vector.broadcast %5 : vector<8x1xf32> to vector<8x256xf32>
    %83 = arith.addf %81, %82 : vector<8x256xf32>
    %84 = arith.addf %0, %83 : vector<8x256xf32>
    %c0_38 = arith.constant 0 : index
    %c5_39 = arith.constant 5 : index
    %85 = vector.load %arg1[%c0_38, %c5_39] : memref<8x20xf32, #tpu.memory_space<vmem>>, vector<8x1xf32>
    %c0_40 = arith.constant 0 : index
    %c6_41 = arith.constant 6 : index
    %86 = vector.load %arg1[%c0_40, %c6_41] : memref<8x20xf32, #tpu.memory_space<vmem>>, vector<8x1xf32>
    %c0_42 = arith.constant 0 : index
    %c7_43 = arith.constant 7 : index
    %87 = vector.load %arg1[%c0_42, %c7_43] : memref<8x20xf32, #tpu.memory_space<vmem>>, vector<8x1xf32>
    %c0_44 = arith.constant 0 : index
    %c8_45 = arith.constant 8 : index
    %88 = vector.load %arg1[%c0_44, %c8_45] : memref<8x20xf32, #tpu.memory_space<vmem>>, vector<8x1xf32>
    %c0_46 = arith.constant 0 : index
    %c9 = arith.constant 9 : index
    %89 = vector.load %arg1[%c0_46, %c9] : memref<8x20xf32, #tpu.memory_space<vmem>>, vector<8x1xf32>
    %c9_47 = arith.constant 9 : index
    %c0_48 = arith.constant 0 : index
    %90 = vector.load %arg2[%c9_47, %c0_48] : memref<36x256xf32, #tpu.memory_space<vmem>>, vector<1x256xf32>
    %c10 = arith.constant 10 : index
    %c0_49 = arith.constant 0 : index
    %91 = vector.load %arg2[%c10, %c0_49] : memref<36x256xf32, #tpu.memory_space<vmem>>, vector<1x256xf32>
    %c11 = arith.constant 11 : index
    %c0_50 = arith.constant 0 : index
    %92 = vector.load %arg2[%c11, %c0_50] : memref<36x256xf32, #tpu.memory_space<vmem>>, vector<1x256xf32>
    %c12 = arith.constant 12 : index
    %c0_51 = arith.constant 0 : index
    %93 = vector.load %arg2[%c12, %c0_51] : memref<36x256xf32, #tpu.memory_space<vmem>>, vector<1x256xf32>
    %c14 = arith.constant 14 : index
    %c0_52 = arith.constant 0 : index
    %94 = vector.load %arg2[%c14, %c0_52] : memref<36x256xf32, #tpu.memory_space<vmem>>, vector<1x256xf32>
    %c15 = arith.constant 15 : index
    %c0_53 = arith.constant 0 : index
    %95 = vector.load %arg2[%c15, %c0_53] : memref<36x256xf32, #tpu.memory_space<vmem>>, vector<1x256xf32>
    %c16 = arith.constant 16 : index
    %c0_54 = arith.constant 0 : index
    %96 = vector.load %arg2[%c16, %c0_54] : memref<36x256xf32, #tpu.memory_space<vmem>>, vector<1x256xf32>
    %c17 = arith.constant 17 : index
    %c0_55 = arith.constant 0 : index
    %97 = vector.load %arg2[%c17, %c0_55] : memref<36x256xf32, #tpu.memory_space<vmem>>, vector<1x256xf32>
    %98 = vector.broadcast %85 : vector<8x1xf32> to vector<8x256xf32>
    %99 = arith.mulf %0, %98 : vector<8x256xf32>
    %100 = vector.broadcast %86 : vector<8x1xf32> to vector<8x256xf32>
    %101 = arith.addf %99, %100 : vector<8x256xf32>
    %cst_56 = arith.constant 0.000000e+00 : f32
    %102 = vector.broadcast %cst_56 : f32 to vector<8x256xf32>
    %103 = arith.maximumf %101, %102 : vector<8x256xf32>
    %c34_i32 = arith.constant 34 : i32
    %104 = tpu.dynamic_rotate %103 by %c34_i32 dim 1 : vector<8x256xf32>, i32 -> vector<8x256xf32>
    %105 = vector.broadcast %90 : vector<1x256xf32> to vector<8x256xf32>
    %106 = arith.mulf %104, %105 : vector<8x256xf32>
    %c32_i32 = arith.constant 32 : i32
    %107 = tpu.dynamic_rotate %103 by %c32_i32 dim 1 : vector<8x256xf32>, i32 -> vector<8x256xf32>
    %108 = vector.broadcast %91 : vector<1x256xf32> to vector<8x256xf32>
    %109 = arith.mulf %107, %108 : vector<8x256xf32>
    %c30_i32 = arith.constant 30 : i32
    %110 = tpu.dynamic_rotate %103 by %c30_i32 dim 1 : vector<8x256xf32>, i32 -> vector<8x256xf32>
    %111 = vector.broadcast %92 : vector<1x256xf32> to vector<8x256xf32>
    %112 = arith.mulf %110, %111 : vector<8x256xf32>
    %c2_i32 = arith.constant 2 : i32
    %113 = tpu.dynamic_rotate %103 by %c2_i32 dim 1 : vector<8x256xf32>, i32 -> vector<8x256xf32>
    %114 = vector.broadcast %93 : vector<1x256xf32> to vector<8x256xf32>
    %115 = arith.mulf %113, %114 : vector<8x256xf32>
    %c254_i32 = arith.constant 254 : i32
    %116 = tpu.dynamic_rotate %103 by %c254_i32 dim 1 : vector<8x256xf32>, i32 -> vector<8x256xf32>
    %117 = vector.broadcast %94 : vector<1x256xf32> to vector<8x256xf32>
    %118 = arith.mulf %116, %117 : vector<8x256xf32>
    %c226_i32 = arith.constant 226 : i32
    %119 = tpu.dynamic_rotate %103 by %c226_i32 dim 1 : vector<8x256xf32>, i32 -> vector<8x256xf32>
    %120 = vector.broadcast %95 : vector<1x256xf32> to vector<8x256xf32>
    %121 = arith.mulf %119, %120 : vector<8x256xf32>
    %c224_i32 = arith.constant 224 : i32
    %122 = tpu.dynamic_rotate %103 by %c224_i32 dim 1 : vector<8x256xf32>, i32 -> vector<8x256xf32>
    %123 = vector.broadcast %96 : vector<1x256xf32> to vector<8x256xf32>
    %124 = arith.mulf %122, %123 : vector<8x256xf32>
    %c222_i32 = arith.constant 222 : i32
    %125 = tpu.dynamic_rotate %103 by %c222_i32 dim 1 : vector<8x256xf32>, i32 -> vector<8x256xf32>
    %126 = vector.broadcast %97 : vector<1x256xf32> to vector<8x256xf32>
    %127 = arith.mulf %125, %126 : vector<8x256xf32>
    %128 = tpu.concatenate %106, %109, %112, %115, %103, %118, %121, %124, %127 in 0 : vector<8x256xf32>, vector<8x256xf32>, vector<8x256xf32>, vector<8x256xf32>, vector<8x256xf32>, vector<8x256xf32>, vector<8x256xf32>, vector<8x256xf32>, vector<8x256xf32> -> vector<72x256xf32>
    %c1_57 = arith.constant 1 : index
    %c0_58 = arith.constant 0 : index
    %c0_59 = arith.constant 0 : index
    %c0_60 = arith.constant 0 : index
    %129 = vector.load %arg3[%c1_57, %c0_58, %c0_59, %c0_60] : memref<4x2x8x72xf32, #tpu.memory_space<vmem>>, vector<1x1x8x72xf32>
    %130 = vector.shape_cast %129 : vector<1x1x8x72xf32> to vector<8x72xf32>
    %cst_61 = arith.constant dense<0.000000e+00> : vector<8x256xf32>
    %131 = tpu.matmul %130, %128, %cst_61 {dimension_numbers = #tpu.dot_dimension_numbers<[1], [0], [0], [1], [0, 0, 1, 1], [], []>} : vector<8x72xf32>, vector<72x256xf32>, vector<8x256xf32> -> vector<8x256xf32>
    %132 = vector.broadcast %87 : vector<8x1xf32> to vector<8x256xf32>
    %133 = arith.mulf %131, %132 : vector<8x256xf32>
    %134 = vector.broadcast %88 : vector<8x1xf32> to vector<8x256xf32>
    %135 = arith.addf %133, %134 : vector<8x256xf32>
    %cst_62 = arith.constant 0.000000e+00 : f32
    %136 = vector.broadcast %cst_62 : f32 to vector<8x256xf32>
    %137 = arith.maximumf %135, %136 : vector<8x256xf32>
    %c34_i32_63 = arith.constant 34 : i32
    %138 = tpu.dynamic_rotate %137 by %c34_i32_63 dim 1 : vector<8x256xf32>, i32 -> vector<8x256xf32>
    %139 = vector.broadcast %90 : vector<1x256xf32> to vector<8x256xf32>
    %140 = arith.mulf %138, %139 : vector<8x256xf32>
    %c32_i32_64 = arith.constant 32 : i32
    %141 = tpu.dynamic_rotate %137 by %c32_i32_64 dim 1 : vector<8x256xf32>, i32 -> vector<8x256xf32>
    %142 = vector.broadcast %91 : vector<1x256xf32> to vector<8x256xf32>
    %143 = arith.mulf %141, %142 : vector<8x256xf32>
    %c30_i32_65 = arith.constant 30 : i32
    %144 = tpu.dynamic_rotate %137 by %c30_i32_65 dim 1 : vector<8x256xf32>, i32 -> vector<8x256xf32>
    %145 = vector.broadcast %92 : vector<1x256xf32> to vector<8x256xf32>
    %146 = arith.mulf %144, %145 : vector<8x256xf32>
    %c2_i32_66 = arith.constant 2 : i32
    %147 = tpu.dynamic_rotate %137 by %c2_i32_66 dim 1 : vector<8x256xf32>, i32 -> vector<8x256xf32>
    %148 = vector.broadcast %93 : vector<1x256xf32> to vector<8x256xf32>
    %149 = arith.mulf %147, %148 : vector<8x256xf32>
    %c254_i32_67 = arith.constant 254 : i32
    %150 = tpu.dynamic_rotate %137 by %c254_i32_67 dim 1 : vector<8x256xf32>, i32 -> vector<8x256xf32>
    %151 = vector.broadcast %94 : vector<1x256xf32> to vector<8x256xf32>
    %152 = arith.mulf %150, %151 : vector<8x256xf32>
    %c226_i32_68 = arith.constant 226 : i32
    %153 = tpu.dynamic_rotate %137 by %c226_i32_68 dim 1 : vector<8x256xf32>, i32 -> vector<8x256xf32>
    %154 = vector.broadcast %95 : vector<1x256xf32> to vector<8x256xf32>
    %155 = arith.mulf %153, %154 : vector<8x256xf32>
    %c224_i32_69 = arith.constant 224 : i32
    %156 = tpu.dynamic_rotate %137 by %c224_i32_69 dim 1 : vector<8x256xf32>, i32 -> vector<8x256xf32>
    %157 = vector.broadcast %96 : vector<1x256xf32> to vector<8x256xf32>
    %158 = arith.mulf %156, %157 : vector<8x256xf32>
    %c222_i32_70 = arith.constant 222 : i32
    %159 = tpu.dynamic_rotate %137 by %c222_i32_70 dim 1 : vector<8x256xf32>, i32 -> vector<8x256xf32>
    %160 = vector.broadcast %97 : vector<1x256xf32> to vector<8x256xf32>
    %161 = arith.mulf %159, %160 : vector<8x256xf32>
    %162 = tpu.concatenate %140, %143, %146, %149, %137, %152, %155, %158, %161 in 0 : vector<8x256xf32>, vector<8x256xf32>, vector<8x256xf32>, vector<8x256xf32>, vector<8x256xf32>, vector<8x256xf32>, vector<8x256xf32>, vector<8x256xf32>, vector<8x256xf32> -> vector<72x256xf32>
    %c1_71 = arith.constant 1 : index
    %c1_72 = arith.constant 1 : index
    %c0_73 = arith.constant 0 : index
    %c0_74 = arith.constant 0 : index
    %163 = vector.load %arg3[%c1_71, %c1_72, %c0_73, %c0_74] : memref<4x2x8x72xf32, #tpu.memory_space<vmem>>, vector<1x1x8x72xf32>
    %164 = vector.shape_cast %163 : vector<1x1x8x72xf32> to vector<8x72xf32>
    %cst_75 = arith.constant dense<0.000000e+00> : vector<8x256xf32>
    %165 = tpu.matmul %164, %162, %cst_75 {dimension_numbers = #tpu.dot_dimension_numbers<[1], [0], [0], [1], [0, 0, 1, 1], [], []>} : vector<8x72xf32>, vector<72x256xf32>, vector<8x256xf32> -> vector<8x256xf32>
    %166 = vector.broadcast %89 : vector<8x1xf32> to vector<8x256xf32>
    %167 = arith.addf %165, %166 : vector<8x256xf32>
    %168 = arith.addf %84, %167 : vector<8x256xf32>
    %c0_76 = arith.constant 0 : index
    %c10_77 = arith.constant 10 : index
    %169 = vector.load %arg1[%c0_76, %c10_77] : memref<8x20xf32, #tpu.memory_space<vmem>>, vector<8x1xf32>
    %c0_78 = arith.constant 0 : index
    %c11_79 = arith.constant 11 : index
    %170 = vector.load %arg1[%c0_78, %c11_79] : memref<8x20xf32, #tpu.memory_space<vmem>>, vector<8x1xf32>
    %c0_80 = arith.constant 0 : index
    %c12_81 = arith.constant 12 : index
    %171 = vector.load %arg1[%c0_80, %c12_81] : memref<8x20xf32, #tpu.memory_space<vmem>>, vector<8x1xf32>
    %c0_82 = arith.constant 0 : index
    %c13 = arith.constant 13 : index
    %172 = vector.load %arg1[%c0_82, %c13] : memref<8x20xf32, #tpu.memory_space<vmem>>, vector<8x1xf32>
    %c0_83 = arith.constant 0 : index
    %c14_84 = arith.constant 14 : index
    %173 = vector.load %arg1[%c0_83, %c14_84] : memref<8x20xf32, #tpu.memory_space<vmem>>, vector<8x1xf32>
    %c18 = arith.constant 18 : index
    %c0_85 = arith.constant 0 : index
    %174 = vector.load %arg2[%c18, %c0_85] : memref<36x256xf32, #tpu.memory_space<vmem>>, vector<1x256xf32>
    %c19 = arith.constant 19 : index
    %c0_86 = arith.constant 0 : index
    %175 = vector.load %arg2[%c19, %c0_86] : memref<36x256xf32, #tpu.memory_space<vmem>>, vector<1x256xf32>
    %c20 = arith.constant 20 : index
    %c0_87 = arith.constant 0 : index
    %176 = vector.load %arg2[%c20, %c0_87] : memref<36x256xf32, #tpu.memory_space<vmem>>, vector<1x256xf32>
    %c21 = arith.constant 21 : index
    %c0_88 = arith.constant 0 : index
    %177 = vector.load %arg2[%c21, %c0_88] : memref<36x256xf32, #tpu.memory_space<vmem>>, vector<1x256xf32>
    %c23 = arith.constant 23 : index
    %c0_89 = arith.constant 0 : index
    %178 = vector.load %arg2[%c23, %c0_89] : memref<36x256xf32, #tpu.memory_space<vmem>>, vector<1x256xf32>
    %c24 = arith.constant 24 : index
    %c0_90 = arith.constant 0 : index
    %179 = vector.load %arg2[%c24, %c0_90] : memref<36x256xf32, #tpu.memory_space<vmem>>, vector<1x256xf32>
    %c25 = arith.constant 25 : index
    %c0_91 = arith.constant 0 : index
    %180 = vector.load %arg2[%c25, %c0_91] : memref<36x256xf32, #tpu.memory_space<vmem>>, vector<1x256xf32>
    %c26 = arith.constant 26 : index
    %c0_92 = arith.constant 0 : index
    %181 = vector.load %arg2[%c26, %c0_92] : memref<36x256xf32, #tpu.memory_space<vmem>>, vector<1x256xf32>
    %182 = vector.broadcast %169 : vector<8x1xf32> to vector<8x256xf32>
    %183 = arith.mulf %0, %182 : vector<8x256xf32>
    %184 = vector.broadcast %170 : vector<8x1xf32> to vector<8x256xf32>
    %185 = arith.addf %183, %184 : vector<8x256xf32>
    %cst_93 = arith.constant 0.000000e+00 : f32
    %186 = vector.broadcast %cst_93 : f32 to vector<8x256xf32>
    %187 = arith.maximumf %185, %186 : vector<8x256xf32>
    %c51_i32 = arith.constant 51 : i32
    %188 = tpu.dynamic_rotate %187 by %c51_i32 dim 1 : vector<8x256xf32>, i32 -> vector<8x256xf32>
    %189 = vector.broadcast %174 : vector<1x256xf32> to vector<8x256xf32>
    %190 = arith.mulf %188, %189 : vector<8x256xf32>
    %c48_i32 = arith.constant 48 : i32
    %191 = tpu.dynamic_rotate %187 by %c48_i32 dim 1 : vector<8x256xf32>, i32 -> vector<8x256xf32>
    %192 = vector.broadcast %175 : vector<1x256xf32> to vector<8x256xf32>
    %193 = arith.mulf %191, %192 : vector<8x256xf32>
    %c45_i32 = arith.constant 45 : i32
    %194 = tpu.dynamic_rotate %187 by %c45_i32 dim 1 : vector<8x256xf32>, i32 -> vector<8x256xf32>
    %195 = vector.broadcast %176 : vector<1x256xf32> to vector<8x256xf32>
    %196 = arith.mulf %194, %195 : vector<8x256xf32>
    %c3_i32 = arith.constant 3 : i32
    %197 = tpu.dynamic_rotate %187 by %c3_i32 dim 1 : vector<8x256xf32>, i32 -> vector<8x256xf32>
    %198 = vector.broadcast %177 : vector<1x256xf32> to vector<8x256xf32>
    %199 = arith.mulf %197, %198 : vector<8x256xf32>
    %c253_i32 = arith.constant 253 : i32
    %200 = tpu.dynamic_rotate %187 by %c253_i32 dim 1 : vector<8x256xf32>, i32 -> vector<8x256xf32>
    %201 = vector.broadcast %178 : vector<1x256xf32> to vector<8x256xf32>
    %202 = arith.mulf %200, %201 : vector<8x256xf32>
    %c211_i32 = arith.constant 211 : i32
    %203 = tpu.dynamic_rotate %187 by %c211_i32 dim 1 : vector<8x256xf32>, i32 -> vector<8x256xf32>
    %204 = vector.broadcast %179 : vector<1x256xf32> to vector<8x256xf32>
    %205 = arith.mulf %203, %204 : vector<8x256xf32>
    %c208_i32 = arith.constant 208 : i32
    %206 = tpu.dynamic_rotate %187 by %c208_i32 dim 1 : vector<8x256xf32>, i32 -> vector<8x256xf32>
    %207 = vector.broadcast %180 : vector<1x256xf32> to vector<8x256xf32>
    %208 = arith.mulf %206, %207 : vector<8x256xf32>
    %c205_i32 = arith.constant 205 : i32
    %209 = tpu.dynamic_rotate %187 by %c205_i32 dim 1 : vector<8x256xf32>, i32 -> vector<8x256xf32>
    %210 = vector.broadcast %181 : vector<1x256xf32> to vector<8x256xf32>
    %211 = arith.mulf %209, %210 : vector<8x256xf32>
    %212 = tpu.concatenate %190, %193, %196, %199, %187, %202, %205, %208, %211 in 0 : vector<8x256xf32>, vector<8x256xf32>, vector<8x256xf32>, vector<8x256xf32>, vector<8x256xf32>, vector<8x256xf32>, vector<8x256xf32>, vector<8x256xf32>, vector<8x256xf32> -> vector<72x256xf32>
    %c2_94 = arith.constant 2 : index
    %c0_95 = arith.constant 0 : index
    %c0_96 = arith.constant 0 : index
    %c0_97 = arith.constant 0 : index
    %213 = vector.load %arg3[%c2_94, %c0_95, %c0_96, %c0_97] : memref<4x2x8x72xf32, #tpu.memory_space<vmem>>, vector<1x1x8x72xf32>
    %214 = vector.shape_cast %213 : vector<1x1x8x72xf32> to vector<8x72xf32>
    %cst_98 = arith.constant dense<0.000000e+00> : vector<8x256xf32>
    %215 = tpu.matmul %214, %212, %cst_98 {dimension_numbers = #tpu.dot_dimension_numbers<[1], [0], [0], [1], [0, 0, 1, 1], [], []>} : vector<8x72xf32>, vector<72x256xf32>, vector<8x256xf32> -> vector<8x256xf32>
    %216 = vector.broadcast %171 : vector<8x1xf32> to vector<8x256xf32>
    %217 = arith.mulf %215, %216 : vector<8x256xf32>
    %218 = vector.broadcast %172 : vector<8x1xf32> to vector<8x256xf32>
    %219 = arith.addf %217, %218 : vector<8x256xf32>
    %cst_99 = arith.constant 0.000000e+00 : f32
    %220 = vector.broadcast %cst_99 : f32 to vector<8x256xf32>
    %221 = arith.maximumf %219, %220 : vector<8x256xf32>
    %c51_i32_100 = arith.constant 51 : i32
    %222 = tpu.dynamic_rotate %221 by %c51_i32_100 dim 1 : vector<8x256xf32>, i32 -> vector<8x256xf32>
    %223 = vector.broadcast %174 : vector<1x256xf32> to vector<8x256xf32>
    %224 = arith.mulf %222, %223 : vector<8x256xf32>
    %c48_i32_101 = arith.constant 48 : i32
    %225 = tpu.dynamic_rotate %221 by %c48_i32_101 dim 1 : vector<8x256xf32>, i32 -> vector<8x256xf32>
    %226 = vector.broadcast %175 : vector<1x256xf32> to vector<8x256xf32>
    %227 = arith.mulf %225, %226 : vector<8x256xf32>
    %c45_i32_102 = arith.constant 45 : i32
    %228 = tpu.dynamic_rotate %221 by %c45_i32_102 dim 1 : vector<8x256xf32>, i32 -> vector<8x256xf32>
    %229 = vector.broadcast %176 : vector<1x256xf32> to vector<8x256xf32>
    %230 = arith.mulf %228, %229 : vector<8x256xf32>
    %c3_i32_103 = arith.constant 3 : i32
    %231 = tpu.dynamic_rotate %221 by %c3_i32_103 dim 1 : vector<8x256xf32>, i32 -> vector<8x256xf32>
    %232 = vector.broadcast %177 : vector<1x256xf32> to vector<8x256xf32>
    %233 = arith.mulf %231, %232 : vector<8x256xf32>
    %c253_i32_104 = arith.constant 253 : i32
    %234 = tpu.dynamic_rotate %221 by %c253_i32_104 dim 1 : vector<8x256xf32>, i32 -> vector<8x256xf32>
    %235 = vector.broadcast %178 : vector<1x256xf32> to vector<8x256xf32>
    %236 = arith.mulf %234, %235 : vector<8x256xf32>
    %c211_i32_105 = arith.constant 211 : i32
    %237 = tpu.dynamic_rotate %221 by %c211_i32_105 dim 1 : vector<8x256xf32>, i32 -> vector<8x256xf32>
    %238 = vector.broadcast %179 : vector<1x256xf32> to vector<8x256xf32>
    %239 = arith.mulf %237, %238 : vector<8x256xf32>
    %c208_i32_106 = arith.constant 208 : i32
    %240 = tpu.dynamic_rotate %221 by %c208_i32_106 dim 1 : vector<8x256xf32>, i32 -> vector<8x256xf32>
    %241 = vector.broadcast %180 : vector<1x256xf32> to vector<8x256xf32>
    %242 = arith.mulf %240, %241 : vector<8x256xf32>
    %c205_i32_107 = arith.constant 205 : i32
    %243 = tpu.dynamic_rotate %221 by %c205_i32_107 dim 1 : vector<8x256xf32>, i32 -> vector<8x256xf32>
    %244 = vector.broadcast %181 : vector<1x256xf32> to vector<8x256xf32>
    %245 = arith.mulf %243, %244 : vector<8x256xf32>
    %246 = tpu.concatenate %224, %227, %230, %233, %221, %236, %239, %242, %245 in 0 : vector<8x256xf32>, vector<8x256xf32>, vector<8x256xf32>, vector<8x256xf32>, vector<8x256xf32>, vector<8x256xf32>, vector<8x256xf32>, vector<8x256xf32>, vector<8x256xf32> -> vector<72x256xf32>
    %c2_108 = arith.constant 2 : index
    %c1_109 = arith.constant 1 : index
    %c0_110 = arith.constant 0 : index
    %c0_111 = arith.constant 0 : index
    %247 = vector.load %arg3[%c2_108, %c1_109, %c0_110, %c0_111] : memref<4x2x8x72xf32, #tpu.memory_space<vmem>>, vector<1x1x8x72xf32>
    %248 = vector.shape_cast %247 : vector<1x1x8x72xf32> to vector<8x72xf32>
    %cst_112 = arith.constant dense<0.000000e+00> : vector<8x256xf32>
    %249 = tpu.matmul %248, %246, %cst_112 {dimension_numbers = #tpu.dot_dimension_numbers<[1], [0], [0], [1], [0, 0, 1, 1], [], []>} : vector<8x72xf32>, vector<72x256xf32>, vector<8x256xf32> -> vector<8x256xf32>
    %250 = vector.broadcast %173 : vector<8x1xf32> to vector<8x256xf32>
    %251 = arith.addf %249, %250 : vector<8x256xf32>
    %252 = arith.addf %168, %251 : vector<8x256xf32>
    %c0_113 = arith.constant 0 : index
    %c15_114 = arith.constant 15 : index
    %253 = vector.load %arg1[%c0_113, %c15_114] : memref<8x20xf32, #tpu.memory_space<vmem>>, vector<8x1xf32>
    %c0_115 = arith.constant 0 : index
    %c16_116 = arith.constant 16 : index
    %254 = vector.load %arg1[%c0_115, %c16_116] : memref<8x20xf32, #tpu.memory_space<vmem>>, vector<8x1xf32>
    %c0_117 = arith.constant 0 : index
    %c17_118 = arith.constant 17 : index
    %255 = vector.load %arg1[%c0_117, %c17_118] : memref<8x20xf32, #tpu.memory_space<vmem>>, vector<8x1xf32>
    %c0_119 = arith.constant 0 : index
    %c18_120 = arith.constant 18 : index
    %256 = vector.load %arg1[%c0_119, %c18_120] : memref<8x20xf32, #tpu.memory_space<vmem>>, vector<8x1xf32>
    %c0_121 = arith.constant 0 : index
    %c19_122 = arith.constant 19 : index
    %257 = vector.load %arg1[%c0_121, %c19_122] : memref<8x20xf32, #tpu.memory_space<vmem>>, vector<8x1xf32>
    %c27 = arith.constant 27 : index
    %c0_123 = arith.constant 0 : index
    %258 = vector.load %arg2[%c27, %c0_123] : memref<36x256xf32, #tpu.memory_space<vmem>>, vector<1x256xf32>
    %c28 = arith.constant 28 : index
    %c0_124 = arith.constant 0 : index
    %259 = vector.load %arg2[%c28, %c0_124] : memref<36x256xf32, #tpu.memory_space<vmem>>, vector<1x256xf32>
    %c29 = arith.constant 29 : index
    %c0_125 = arith.constant 0 : index
    %260 = vector.load %arg2[%c29, %c0_125] : memref<36x256xf32, #tpu.memory_space<vmem>>, vector<1x256xf32>
    %c30 = arith.constant 30 : index
    %c0_126 = arith.constant 0 : index
    %261 = vector.load %arg2[%c30, %c0_126] : memref<36x256xf32, #tpu.memory_space<vmem>>, vector<1x256xf32>
    %c32 = arith.constant 32 : index
    %c0_127 = arith.constant 0 : index
    %262 = vector.load %arg2[%c32, %c0_127] : memref<36x256xf32, #tpu.memory_space<vmem>>, vector<1x256xf32>
    %c33 = arith.constant 33 : index
    %c0_128 = arith.constant 0 : index
    %263 = vector.load %arg2[%c33, %c0_128] : memref<36x256xf32, #tpu.memory_space<vmem>>, vector<1x256xf32>
    %c34 = arith.constant 34 : index
    %c0_129 = arith.constant 0 : index
    %264 = vector.load %arg2[%c34, %c0_129] : memref<36x256xf32, #tpu.memory_space<vmem>>, vector<1x256xf32>
    %c35 = arith.constant 35 : index
    %c0_130 = arith.constant 0 : index
    %265 = vector.load %arg2[%c35, %c0_130] : memref<36x256xf32, #tpu.memory_space<vmem>>, vector<1x256xf32>
    %266 = vector.broadcast %253 : vector<8x1xf32> to vector<8x256xf32>
    %267 = arith.mulf %0, %266 : vector<8x256xf32>
    %268 = vector.broadcast %254 : vector<8x1xf32> to vector<8x256xf32>
    %269 = arith.addf %267, %268 : vector<8x256xf32>
    %cst_131 = arith.constant 0.000000e+00 : f32
    %270 = vector.broadcast %cst_131 : f32 to vector<8x256xf32>
    %271 = arith.maximumf %269, %270 : vector<8x256xf32>
    %c68_i32 = arith.constant 68 : i32
    %272 = tpu.dynamic_rotate %271 by %c68_i32 dim 1 : vector<8x256xf32>, i32 -> vector<8x256xf32>
    %273 = vector.broadcast %258 : vector<1x256xf32> to vector<8x256xf32>
    %274 = arith.mulf %272, %273 : vector<8x256xf32>
    %c64_i32 = arith.constant 64 : i32
    %275 = tpu.dynamic_rotate %271 by %c64_i32 dim 1 : vector<8x256xf32>, i32 -> vector<8x256xf32>
    %276 = vector.broadcast %259 : vector<1x256xf32> to vector<8x256xf32>
    %277 = arith.mulf %275, %276 : vector<8x256xf32>
    %c60_i32 = arith.constant 60 : i32
    %278 = tpu.dynamic_rotate %271 by %c60_i32 dim 1 : vector<8x256xf32>, i32 -> vector<8x256xf32>
    %279 = vector.broadcast %260 : vector<1x256xf32> to vector<8x256xf32>
    %280 = arith.mulf %278, %279 : vector<8x256xf32>
    %c4_i32 = arith.constant 4 : i32
    %281 = tpu.dynamic_rotate %271 by %c4_i32 dim 1 : vector<8x256xf32>, i32 -> vector<8x256xf32>
    %282 = vector.broadcast %261 : vector<1x256xf32> to vector<8x256xf32>
    %283 = arith.mulf %281, %282 : vector<8x256xf32>
    %c252_i32 = arith.constant 252 : i32
    %284 = tpu.dynamic_rotate %271 by %c252_i32 dim 1 : vector<8x256xf32>, i32 -> vector<8x256xf32>
    %285 = vector.broadcast %262 : vector<1x256xf32> to vector<8x256xf32>
    %286 = arith.mulf %284, %285 : vector<8x256xf32>
    %c196_i32 = arith.constant 196 : i32
    %287 = tpu.dynamic_rotate %271 by %c196_i32 dim 1 : vector<8x256xf32>, i32 -> vector<8x256xf32>
    %288 = vector.broadcast %263 : vector<1x256xf32> to vector<8x256xf32>
    %289 = arith.mulf %287, %288 : vector<8x256xf32>
    %c192_i32 = arith.constant 192 : i32
    %290 = tpu.dynamic_rotate %271 by %c192_i32 dim 1 : vector<8x256xf32>, i32 -> vector<8x256xf32>
    %291 = vector.broadcast %264 : vector<1x256xf32> to vector<8x256xf32>
    %292 = arith.mulf %290, %291 : vector<8x256xf32>
    %c188_i32 = arith.constant 188 : i32
    %293 = tpu.dynamic_rotate %271 by %c188_i32 dim 1 : vector<8x256xf32>, i32 -> vector<8x256xf32>
    %294 = vector.broadcast %265 : vector<1x256xf32> to vector<8x256xf32>
    %295 = arith.mulf %293, %294 : vector<8x256xf32>
    %296 = tpu.concatenate %274, %277, %280, %283, %271, %286, %289, %292, %295 in 0 : vector<8x256xf32>, vector<8x256xf32>, vector<8x256xf32>, vector<8x256xf32>, vector<8x256xf32>, vector<8x256xf32>, vector<8x256xf32>, vector<8x256xf32>, vector<8x256xf32> -> vector<72x256xf32>
    %c3_132 = arith.constant 3 : index
    %c0_133 = arith.constant 0 : index
    %c0_134 = arith.constant 0 : index
    %c0_135 = arith.constant 0 : index
    %297 = vector.load %arg3[%c3_132, %c0_133, %c0_134, %c0_135] : memref<4x2x8x72xf32, #tpu.memory_space<vmem>>, vector<1x1x8x72xf32>
    %298 = vector.shape_cast %297 : vector<1x1x8x72xf32> to vector<8x72xf32>
    %cst_136 = arith.constant dense<0.000000e+00> : vector<8x256xf32>
    %299 = tpu.matmul %298, %296, %cst_136 {dimension_numbers = #tpu.dot_dimension_numbers<[1], [0], [0], [1], [0, 0, 1, 1], [], []>} : vector<8x72xf32>, vector<72x256xf32>, vector<8x256xf32> -> vector<8x256xf32>
    %300 = vector.broadcast %255 : vector<8x1xf32> to vector<8x256xf32>
    %301 = arith.mulf %299, %300 : vector<8x256xf32>
    %302 = vector.broadcast %256 : vector<8x1xf32> to vector<8x256xf32>
    %303 = arith.addf %301, %302 : vector<8x256xf32>
    %cst_137 = arith.constant 0.000000e+00 : f32
    %304 = vector.broadcast %cst_137 : f32 to vector<8x256xf32>
    %305 = arith.maximumf %303, %304 : vector<8x256xf32>
    %c68_i32_138 = arith.constant 68 : i32
    %306 = tpu.dynamic_rotate %305 by %c68_i32_138 dim 1 : vector<8x256xf32>, i32 -> vector<8x256xf32>
    %307 = vector.broadcast %258 : vector<1x256xf32> to vector<8x256xf32>
    %308 = arith.mulf %306, %307 : vector<8x256xf32>
    %c64_i32_139 = arith.constant 64 : i32
    %309 = tpu.dynamic_rotate %305 by %c64_i32_139 dim 1 : vector<8x256xf32>, i32 -> vector<8x256xf32>
    %310 = vector.broadcast %259 : vector<1x256xf32> to vector<8x256xf32>
    %311 = arith.mulf %309, %310 : vector<8x256xf32>
    %c60_i32_140 = arith.constant 60 : i32
    %312 = tpu.dynamic_rotate %305 by %c60_i32_140 dim 1 : vector<8x256xf32>, i32 -> vector<8x256xf32>
    %313 = vector.broadcast %260 : vector<1x256xf32> to vector<8x256xf32>
    %314 = arith.mulf %312, %313 : vector<8x256xf32>
    %c4_i32_141 = arith.constant 4 : i32
    %315 = tpu.dynamic_rotate %305 by %c4_i32_141 dim 1 : vector<8x256xf32>, i32 -> vector<8x256xf32>
    %316 = vector.broadcast %261 : vector<1x256xf32> to vector<8x256xf32>
    %317 = arith.mulf %315, %316 : vector<8x256xf32>
    %c252_i32_142 = arith.constant 252 : i32
    %318 = tpu.dynamic_rotate %305 by %c252_i32_142 dim 1 : vector<8x256xf32>, i32 -> vector<8x256xf32>
    %319 = vector.broadcast %262 : vector<1x256xf32> to vector<8x256xf32>
    %320 = arith.mulf %318, %319 : vector<8x256xf32>
    %c196_i32_143 = arith.constant 196 : i32
    %321 = tpu.dynamic_rotate %305 by %c196_i32_143 dim 1 : vector<8x256xf32>, i32 -> vector<8x256xf32>
    %322 = vector.broadcast %263 : vector<1x256xf32> to vector<8x256xf32>
    %323 = arith.mulf %321, %322 : vector<8x256xf32>
    %c192_i32_144 = arith.constant 192 : i32
    %324 = tpu.dynamic_rotate %305 by %c192_i32_144 dim 1 : vector<8x256xf32>, i32 -> vector<8x256xf32>
    %325 = vector.broadcast %264 : vector<1x256xf32> to vector<8x256xf32>
    %326 = arith.mulf %324, %325 : vector<8x256xf32>
    %c188_i32_145 = arith.constant 188 : i32
    %327 = tpu.dynamic_rotate %305 by %c188_i32_145 dim 1 : vector<8x256xf32>, i32 -> vector<8x256xf32>
    %328 = vector.broadcast %265 : vector<1x256xf32> to vector<8x256xf32>
    %329 = arith.mulf %327, %328 : vector<8x256xf32>
    %330 = tpu.concatenate %308, %311, %314, %317, %305, %320, %323, %326, %329 in 0 : vector<8x256xf32>, vector<8x256xf32>, vector<8x256xf32>, vector<8x256xf32>, vector<8x256xf32>, vector<8x256xf32>, vector<8x256xf32>, vector<8x256xf32>, vector<8x256xf32> -> vector<72x256xf32>
    %c3_146 = arith.constant 3 : index
    %c1_147 = arith.constant 1 : index
    %c0_148 = arith.constant 0 : index
    %c0_149 = arith.constant 0 : index
    %331 = vector.load %arg3[%c3_146, %c1_147, %c0_148, %c0_149] : memref<4x2x8x72xf32, #tpu.memory_space<vmem>>, vector<1x1x8x72xf32>
    %332 = vector.shape_cast %331 : vector<1x1x8x72xf32> to vector<8x72xf32>
    %cst_150 = arith.constant dense<0.000000e+00> : vector<8x256xf32>
    %333 = tpu.matmul %332, %330, %cst_150 {dimension_numbers = #tpu.dot_dimension_numbers<[1], [0], [0], [1], [0, 0, 1, 1], [], []>} : vector<8x72xf32>, vector<72x256xf32>, vector<8x256xf32> -> vector<8x256xf32>
    %334 = vector.broadcast %257 : vector<8x1xf32> to vector<8x256xf32>
    %335 = arith.addf %333, %334 : vector<8x256xf32>
    %336 = arith.addf %252, %335 : vector<8x256xf32>
    %c0_151 = arith.constant 0 : index
    %c0_152 = arith.constant 0 : index
    %337 = vector.load %arg4[%c0_151, %c0_152] : memref<8x256xf32, #tpu.memory_space<vmem>>, vector<8x256xf32>
    tpu.vector_store %arg4[%c0_151, %c0_152], %336 {strides = array<i32>} : memref<8x256xf32, #tpu.memory_space<vmem>>, vector<8x256xf32>,
    return
  }
}

</mosaic_0001>

<bundles_post_ra>
// kernel: tile.82
= control target key start
LH: loop header
LB: loop body
LE: loop exit
PB: predicated region body
PF: predicated region fallthrough
CT: control target
= control target key end

     0   :  { %s22_s0 = inlined_call_operand.vmem [shape: f32[4], index: 0, kind: input, shape index: {}]   ;;  %s23_s1 = inlined_call_operand.vmem [shape: f32[2,4], index: 1, kind: output, shape index: {}]  }
   0x1   :  { %v4_v0 = vld [vmem:[%s22_s0] ss:$0 sm:$0xff] }
   0x2   :  { %5 = vst [vmem:[%s23_s1] sm:$0x3] %v4_v0 }

// kernel: tile.0
= control target key start
LH: loop header
LB: loop body
LE: loop exit
PB: predicated region body
PF: predicated region fallthrough
CT: control target
= control target key end

     0   :  { %s34_s8 = smov 125   ;;  %vm7_vm0 = vcmask 7168   ;;  %s35_s11 = smov 126   ;;  %s61_s0 = inlined_call_operand.vmem [shape: f32[2,4], index: 0, kind: input, shape index: {}]   ;;  %s62_s1 = inlined_call_operand.vmem [shape: f32[8,1], index: 1, kind: output, shape index: {}]  }
   0x1   :  { %v4_v0 = vld [vmem:[%s61_s0] sm:$0x3]  ;;  %s33_s0 = smov 127  }
   0x2   :  { %5 = vst [vmem:[#allocation0] sm:$0x3] %v4_v0 }
   0x9   :  { %v9_v1 = vld [vmem:[#allocation0] sm:$0x3]  }
   0xa   :  { %v21_v2 = vld [vmem:[#allocation0] sm:$0x3]   ;;  %10 = vrot.lane.b32.xlu0 %v9_v1, %s33_s0 }
   0xb   :  { %22 = vrot.lane.b32.xlu1 %v21_v2, %s34_s8  ;;  %v6_v3 = vld [vmem:[#allocation0] sm:$0x3]  }
   0xc   :  { %v15_v4 = vld [vmem:[#allocation0] sm:$0x3]   ;;  %8 = vst.msk [vmem:[%s62_s1] ss:$4 sm:$0x3] %vm7_vm0, %v6_v3  }
   0xe   :  { %16 = vrot.lane.b32.xlu0 %v15_v4, %s35_s11 }
  0x7c   :  { %v11_v5 = vpop.permute.xlu0 %10  }
  0x7d   :  { %v23_v6 = vpop.permute.xlu1 %22   ;;  %27 = vst.msk [vmem:[%s62_s1 + $0x1] ss:$4 sm:$0x3] %vm7_vm0, %v11_v5  }
  0x7e   :  { %29 = vst.msk [vmem:[%s62_s1 + $0x3] ss:$4 sm:$0x3] %vm7_vm0, %v23_v6  }
  0x80   :  { %v17_v7 = vpop.permute.xlu0 %16  }
  0x81   :  { %28 = vst.msk [vmem:[%s62_s1 + $0x2] ss:$4 sm:$0x3] %vm7_vm0, %v17_v7  }

// kernel: resblock4_pallas.1
= control target key start
LH: loop header
LB: loop body
LE: loop exit
PB: predicated region body
PF: predicated region fallthrough
CT: control target
= control target key end

     0   :  { %v1957_v0 = vmov 0   ;;  %v1958_v2 = vmov 5   ;;  %v1959_v3 = vmov 1   ;;  %v1960_v4 = vmov 6   ;;  %s1965_s21 = smov 17   ;;  %s1966_s22 = smov 16   ;;  %s3093_s1 = inlined_call_operand.vmem [shape: f32[8,20], index: 1, kind: input, shape index: {}]   ;;  %s3094_s0 = inlined_call_operand.vmem [shape: f32[8,256], index: 0, kind: input, shape index: {}]   ;;  %s3095_s2 = inlined_call_operand.vmem [shape: f32[36,256], index: 2, kind: input, shape index: {}]   ;;  %s3096_s3 = inlined_call_operand.vmem [shape: f32[4,2,8,72], index: 3, kind: input, shape index: {}]   ;;  %s3097_s4 = inlined_call_operand.vmem [shape: f32[8,256], index: 4, kind: output, shape index: {}]  }
   0x1   :  { %1933 = vset.pattern.permute.xlu0 %v1957_v0  ;;  %v2035_v1 = vld [vmem:[%s3093_s1] sm:$0xff]  ;;  %1935 = vset.pattern.permute.xlu1 %v1958_v2  ;;  %v1961_v5 = vmov 10   ;;  %v1962_v6 = vmov 11   ;;  %v1963_v7 = vmov 15   ;;  %v1964_v8 = vmov 16   ;;  %v2053_v11 = vld [vmem:[%s3094_s0 + $0x8] sm:$0xff] }
   0x2   :  { %37 = vperm.xlu0 %1933, %v2035_v1   ;;  %465 = vperm.xlu1 %1935, %v2035_v1   ;;  %v2048_v10 = vld [vmem:[%s3094_s0] sm:$0xff]  ;;  %s1967_s23 = smov 15   ;;  %s1968_s24 = smov 1   ;;  %v3122_v20 = vmov 0.0   ;;  %v54_v44 = vlaneseq  ;;  %v1993_v45 = vmov 2   ;;  %v1994_v47 = vmov 3  }
   0x3   :  { %s1969_s25 = smov 127   ;;  %s1970_s26 = smov 113   ;;  %281 = vmatprep.mubr.f32.mxu0 %v3122_v20  ;;  %439 = vmatprep.mubr.f32.mxu1 %v3122_v20  ;;  %v20_v51 = vld [vmem:[%s3095_s2] ss:$8 sm:$0x3]  ;;  %vm213_vm9 = vcmask 588800  }
   0x4   :  { %s1972_s27 = smov 112   ;;  %s1973_s28 = smov 111   ;;  %v61_v46 = vshrl.u32 %v54_v44, 7  ;;  %v2193_v48 = vand.u32 127, %v54_v44 }
   0x5   :  { %s1974_s29 = smov 34   ;;  %s1975_s30 = smov 32   ;;  %v1693_v52 = vld [vmem:[%s3095_s2 + $0x1] ss:$8 sm:$0x3] }
   0x6   :  { %1934 = vset.pattern.permute.xlu0 %v1959_v3  ;;  %1936 = vset.pattern.permute.xlu1 %v1960_v4  ;;  %s1976_s5 = smov 30   ;;  %s1977_s6 = smov 2   ;;  %v2195_v49 = vsub.s32 0, %v61_v46  ;;  %v2197_v50 = vsub.s32 1, %v61_v46  ;;  %vm56_vm0 = vcmp.lt.s32.totalorder %v2193_v48, 17  ;;  %vm76_vm1 = vcmp.lt.s32.totalorder %v2193_v48, 16 }
   0x7   :  { %43 = vperm.xlu0 %1934, %v2035_v1   ;;  %471 = vperm.xlu1 %1936, %v2035_v1   ;;  %s1978_s7 = smov 126   ;;  %s1979_s8 = smov 98   ;;  %v1694_v3 = vld [vmem:[%s3095_s2 + $0x2] ss:$8 sm:$0x3]  ;;  %vm96_vm2 = vcmp.lt.s32.totalorder %v2193_v48, 15 }
   0x8   :  { %s1980_s9 = smov 96   ;;  %s1981_s10 = smov 94   ;;  %v2211_v55 = vrot.slane %v20_v51, %v2197_v50  ;;  %v2214_v56 = vrot.slane %v20_v51, %v2195_v49  ;;  %v2220_v58 = vrot.slane %v1693_v52, %v2197_v50  ;;  %v2223_v59 = vrot.slane %v1693_v52, %v2195_v49 }
   0x9   :  { %s1982_s11 = smov 51   ;;  %s1983_s12 = smov 48   ;;  %vm116_vm3 = vcmp.lt.s32.totalorder %v2193_v48, 1  ;;  %vm136_vm4 = vcmp.lt.s32.totalorder %v2193_v48, 127  ;;  %v2001_v46 = vmov 13   ;;  %vm156_vm5 = vcmp.lt.s32.totalorder %v2193_v48, 113 }
   0xa   :  { %s1984_s13 = smov 45   ;;  %s1985_s14 = smov 3   ;;  %vm176_vm6 = vcmp.lt.s32.totalorder %v2193_v48, 112  ;;  %vm196_vm7 = vcmp.lt.s32.totalorder %v2193_v48, 111  ;;  %vm482_vm8 = vcmp.lt.s32.totalorder %v2193_v48, 34  ;;  %vm502_vm10 = vcmp.lt.s32.totalorder %v2193_v48, 32 }
   0xb   :  { %1937 = vset.pattern.permute.xlu1 %v1961_v5  ;;  %1938 = vset.pattern.permute.xlu0 %v1962_v6  ;;  %s3114_s15 = smov 125   ;;  %s3110_s16 = smov 83   ;;  %vm522_vm11 = vcmp.lt.s32.totalorder %v2193_v48, 30  ;;  %vm542_vm12 = vcmp.lt.s32.totalorder %v2193_v48, 2  ;;  %vm3116_vm13 = vcmp.lt.s32.totalorder %v2193_v48, 126  ;;  %vm3121_vm14 = vcmp.lt.s32.totalorder %v2193_v48, 98 }
   0xc   :  { %891 = vperm.xlu1 %1937, %v2035_v1   ;;  %897 = vperm.xlu0 %1938, %v2035_v1   ;;  %s3098_s17 = smov 80   ;;  %s3106_s18 = smov 77   ;;  %vm3117_vm15 = vcmp.lt.s32.totalorder %v2193_v48, 96 }
   0xd   :  { %s3100_s19 = smov 68   ;;  %s3102_s20 = smov 64  }
  0x10   :  { %1939 = vset.pattern.permute.xlu1 %v1963_v7  ;;  %1941 = vset.pattern.permute.xlu0 %v1993_v45  ;;  %v1997_v7 = vmov 7  }
  0x11   :  { %1317 = vperm.xlu1 %1939, %v2035_v1  }
  0x15   :  { %1940 = vset.pattern.permute.xlu1 %v1964_v8  ;;  %v1998_v8 = vmov 8  }
  0x16   :  { %1323 = vperm.xlu1 %1940, %v2035_v1  }
  0x1a   :  { %1942 = vset.pattern.permute.xlu1 %v1994_v47 }
  0x81   :  { %v38_v9 = vpop.permute.xlu0 %37  ;;  %v466_v19 = vpop.permute.xlu1 %465 }
  0x82   :  { %v40_v12 = vmul.f32 %v38_v9, %v2048_v10  ;;  %v41_v13 = vmul.f32 %v38_v9, %v2053_v11  ;;  %v468_v21 = vmul.f32 %v466_v19, %v2048_v10  ;;  %v469_v22 = vmul.f32 %v466_v19, %v2053_v11  ;;  %v1695_v9 = vld [vmem:[%s3095_s2 + $0x3] ss:$8 sm:$0x3] }
  0x83   :  { %v2257_v19 = vrot.slane %v1695_v9, %v2195_v49 }
  0x86   :  { %v44_v14 = vpop.permute.xlu0 %43  ;;  %v472_v23 = vpop.permute.xlu1 %471 }
  0x87   :  { %v46_v15 = vadd.f32 %v44_v14, %v40_v12  ;;  %v47_v16 = vadd.f32 %v44_v14, %v41_v13  ;;  %v474_v24 = vadd.f32 %v472_v23, %v468_v21  ;;  %v475_v25 = vadd.f32 %v472_v23, %v469_v22 }
  0x88   :  { %v2247_v14 = vrot.slane %v1694_v3, %v2195_v49  ;;  %v2260_v21 = vrot.slane %v1695_v9, %v2197_v50 }
  0x89   :  { %v2057_v17 = vmax.f32 %v46_v15, 0.0  ;;  %v2059_v18 = vmax.f32 %v47_v16, 0.0  ;;  %v2097_v26 = vmax.f32 %v474_v24, 0.0  ;;  %v2099_v27 = vmax.f32 %v475_v25, 0.0 }
  0x8a   :  { %v1696_v15 = vld [vmem:[%s3095_s2 + $0x5] ss:$8 sm:$0x3]  ;;  %v2253_v16 = vrot.slane %v1694_v3, %v2197_v50  ;;  %v1999_v24 = vmov 12  }
  0x8b   :  { %52 = vrot.lane.b32.xlu1 %v2059_v18, %s1965_s21  ;;  %50 = vrot.lane.b32.xlu0 %v2057_v17, %s1965_s21  ;;  %v892_v28 = vpop.permute.xlu1 %891  ;;  %v898_v31 = vpop.permute.xlu0 %897 }
  0x8c   :  { %v894_v29 = vmul.f32 %v892_v28, %v2048_v10  ;;  %v895_v30 = vmul.f32 %v892_v28, %v2053_v11 }
  0x8e   :  { %v900_v32 = vadd.f32 %v898_v31, %v894_v29  ;;  %v901_v33 = vadd.f32 %v898_v31, %v895_v30  ;;  %v2268_v29 = vrot.slane %v1696_v15, %v2195_v49  ;;  %v2000_v30 = vmov 17  }
  0x8f   :  { %74 = vrot.lane.b32.xlu1 %v2059_v18, %s1966_s22  ;;  %72 = vrot.lane.b32.xlu0 %v2057_v17, %s1966_s22 }
  0x90   :  { %v2131_v34 = vmax.f32 %v900_v32, 0.0  ;;  %v2133_v35 = vmax.f32 %v901_v33, 0.0  ;;  %v1318_v36 = vpop.permute.xlu1 %1317  ;;  %v2276_v33 = vrot.slane %v1696_v15, %v2197_v50 }
  0x91   :  { %v1320_v37 = vmul.f32 %v1318_v36, %v2048_v10  ;;  %v1321_v38 = vmul.f32 %v1318_v36, %v2053_v11 }
  0x93   :  { %94 = vrot.lane.b32.xlu1 %v2059_v18, %s1967_s23  ;;  %92 = vrot.lane.b32.xlu0 %v2057_v17, %s1967_s23 }
  0x95   :  { %v1324_v39 = vpop.permute.xlu1 %1323 }
  0x96   :  { %v1326_v40 = vadd.f32 %v1324_v39, %v1320_v37  ;;  %v1327_v41 = vadd.f32 %v1324_v39, %v1321_v38 }
  0x97   :  { %114 = vrot.lane.b32.xlu1 %v2059_v18, %s1968_s24  ;;  %112 = vrot.lane.b32.xlu0 %v2057_v17, %s1968_s24 }
  0x98   :  { %v2169_v42 = vmax.f32 %v1326_v40, 0.0  ;;  %v2171_v43 = vmax.f32 %v1327_v41, 0.0 }
  0x9b   :  { %134 = vrot.lane.b32.xlu1 %v2059_v18, %s1969_s25  ;;  %132 = vrot.lane.b32.xlu0 %v2057_v17, %s1969_s25 }
  0x9f   :  { %154 = vrot.lane.b32.xlu1 %v2059_v18, %s1970_s26  ;;  %152 = vrot.lane.b32.xlu0 %v2057_v17, %s1970_s26 }
  0xa3   :  { %174 = vrot.lane.b32.xlu1 %v2059_v18, %s1972_s27  ;;  %172 = vrot.lane.b32.xlu0 %v2057_v17, %s1972_s27 }
  0xa7   :  { %194 = vrot.lane.b32.xlu1 %v2059_v18, %s1973_s28  ;;  %192 = vrot.lane.b32.xlu0 %v2057_v17, %s1973_s28 }
  0xab   :  { %480 = vrot.lane.b32.xlu1 %v2099_v27, %s1974_s29  ;;  %478 = vrot.lane.b32.xlu0 %v2097_v26, %s1974_s29 }
  0xaf   :  { %500 = vrot.lane.b32.xlu1 %v2099_v27, %s1975_s30  ;;  %498 = vrot.lane.b32.xlu0 %v2097_v26, %s1975_s30 }
  0xb3   :  { %520 = vrot.lane.b32.xlu1 %v2099_v27, %s1976_s5  ;;  %518 = vrot.lane.b32.xlu0 %v2097_v26, %s1976_s5 }
  0xb7   :  { %540 = vrot.lane.b32.xlu1 %v2099_v27, %s1977_s6  ;;  %538 = vrot.lane.b32.xlu0 %v2097_v26, %s1977_s6 }
  0xbb   :  { %560 = vrot.lane.b32.xlu1 %v2099_v27, %s1978_s7  ;;  %558 = vrot.lane.b32.xlu0 %v2097_v26, %s1978_s7 }
  0xbf   :  { %580 = vrot.lane.b32.xlu1 %v2099_v27, %s1979_s8  ;;  %578 = vrot.lane.b32.xlu0 %v2097_v26, %s1979_s8 }
  0xc3   :  { %600 = vrot.lane.b32.xlu1 %v2099_v27, %s1980_s9  ;;  %598 = vrot.lane.b32.xlu0 %v2097_v26, %s1980_s9 }
  0xc7   :  { %620 = vrot.lane.b32.xlu1 %v2099_v27, %s1981_s10  ;;  %618 = vrot.lane.b32.xlu0 %v2097_v26, %s1981_s10 }
  0xcb   :  { %906 = vrot.lane.b32.xlu1 %v2133_v35, %s1982_s11  ;;  %904 = vrot.lane.b32.xlu0 %v2131_v34, %s1982_s11 }
  0xcf   :  { %926 = vrot.lane.b32.xlu1 %v2133_v35, %s1983_s12  ;;  %924 = vrot.lane.b32.xlu0 %v2131_v34, %s1983_s12 }
  0xd3   :  { %946 = vrot.lane.b32.xlu1 %v2133_v35, %s1984_s13  ;;  %944 = vrot.lane.b32.xlu0 %v2131_v34, %s1984_s13 }
  0xd7   :  { %966 = vrot.lane.b32.xlu1 %v2133_v35, %s1985_s14  ;;  %964 = vrot.lane.b32.xlu0 %v2131_v34, %s1985_s14 }
  0xdb   :  { %986 = vrot.lane.b32.xlu1 %v2133_v35, %s3114_s15  ;;  %984 = vrot.lane.b32.xlu0 %v2131_v34, %s3114_s15 }
  0xdf   :  { %1006 = vrot.lane.b32.xlu1 %v2133_v35, %s3110_s16  ;;  %1004 = vrot.lane.b32.xlu0 %v2131_v34, %s3110_s16 }
  0xe3   :  { %1026 = vrot.lane.b32.xlu1 %v2133_v35, %s3098_s17  ;;  %1024 = vrot.lane.b32.xlu0 %v2131_v34, %s3098_s17  ;;  %s3104_s17 = smov 60  }
  0xe7   :  { %1046 = vrot.lane.b32.xlu1 %v2133_v35, %s3106_s18  ;;  %1044 = vrot.lane.b32.xlu0 %v2131_v34, %s3106_s18 }
  0xeb   :  { %1332 = vrot.lane.b32.xlu1 %v2171_v43, %s3100_s19  ;;  %1330 = vrot.lane.b32.xlu0 %v2169_v42, %s3100_s19  ;;  %s3108_s19 = smov 4  }
  0xef   :  { %1352 = vrot.lane.b32.xlu1 %v2171_v43, %s3102_s20  ;;  %1350 = vrot.lane.b32.xlu0 %v2169_v42, %s3102_s20  ;;  %s3112_s20 = smov 124  }
  0xf3   :  { %1372 = vrot.lane.b32.xlu1 %v2171_v43, %s3104_s17  ;;  %1370 = vrot.lane.b32.xlu0 %v2169_v42, %s3104_s17 }
  0xf7   :  { %1392 = vrot.lane.b32.xlu1 %v2171_v43, %s3108_s19  ;;  %1390 = vrot.lane.b32.xlu0 %v2169_v42, %s3108_s19 }
  0xfb   :  { %1412 = vrot.lane.b32.xlu1 %v2171_v43, %s3112_s20  ;;  %1410 = vrot.lane.b32.xlu0 %v2169_v42, %s3112_s20 }
  0xfd   :  { %v53_v53 = vpop.permute.xlu1 %52  ;;  %v51_v54 = vpop.permute.xlu0 %50 }
  0xfe   :  { %v57_v57 = vsel %vm56_vm0, %v51_v54, %v53_v53  ;;  %v58_v60 = vsel %vm56_vm0, %v53_v53, %v51_v54  ;;  %v1697_v54 = vld [vmem:[%s3095_s2 + $0x6] ss:$8 sm:$0x3] }
  0xff   :  { %289 = vperm.xlu0 %1941, %v2035_v1   ;;  %295 = vperm.xlu1 %1942, %v2035_v1   ;;  %v71_v0 = vmul.f32 %v2211_v55, %v57_v57  ;;  %v70_v5 = vmul.f32 %v2214_v56, %v58_v60  ;;  %v1698_v57 = vld [vmem:[%s3095_s2 + $0x7] ss:$8 sm:$0x3]  ;;  %v2303_v3 = vrot.slane %v1697_v54, %v2197_v50 }
 0x101   :  { %v75_v61 = vpop.permute.xlu1 %74  ;;  %v73_v62 = vpop.permute.xlu0 %72 }
 0x102   :  { %v78_v63 = vsel %vm76_vm1, %v75_v61, %v73_v62  ;;  %v77_v2 = vsel %vm76_vm1, %v73_v62, %v75_v61 }
 0x103   :  { %v91_v4 = vmul.f32 %v2220_v58, %v77_v2  ;;  %v90_v6 = vmul.f32 %v2223_v59, %v78_v63  ;;  %1943 = vset.pattern.permute.xlu1 %v1997_v7  ;;  %1944 = vset.pattern.permute.xlu0 %v1998_v8  ;;  %v2002_v2 = vmov 18  }
 0x104   :  { %715 = vperm.xlu1 %1943, %v2035_v1   ;;  %721 = vperm.xlu0 %1944, %v2035_v1  }
 0x105   :  { %v95_v10 = vpop.permute.xlu1 %94  ;;  %v93_v11 = vpop.permute.xlu0 %92  ;;  %v1739_v12 = vpack.c.bf16 %v91_v4, %v71_v0  ;;  %v1741_v13 = vpack.c.bf16 %v90_v6, %v70_v5  ;;  %v2300_v0 = vrot.slane %v1697_v54, %v2195_v49  ;;  %v2307_v4 = vrot.slane %v1698_v57, %v2195_v49 }
 0x106   :  { %v97_v22 = vsel %vm96_vm2, %v93_v11, %v95_v10  ;;  %v98_v23 = vsel %vm96_vm2, %v95_v10, %v93_v11  ;;  %v2310_v5 = vrot.slane %v1698_v57, %v2197_v50 }
 0x107   :  { %1740 = vmatprep.subr.bf16.mxu0 %v1739_v12  ;;  %v110_v36 = vmul.f32 %v2247_v14, %v98_v23  ;;  %v111_v37 = vmul.f32 %v2253_v16, %v97_v22 }
 0x108   :  { %1742 = vmatpush1.bf16.msra.mxu0 %v1741_v13  ;;  %1945 = vset.pattern.permute.xlu1 %v1999_v24 }
 0x109   :  { %v115_v25 = vpop.permute.xlu1 %114  ;;  %v113_v28 = vpop.permute.xlu0 %112  ;;  %1141 = vperm.xlu1 %1945, %v2035_v1   ;;  %1947 = vset.pattern.permute.xlu0 %v2000_v30 }
 0x10a   :  { %v117_v31 = vsel %vm116_vm3, %v113_v28, %v115_v25  ;;  %v118_v32 = vsel %vm116_vm3, %v115_v25, %v113_v28  ;;  %1546 = vperm.xlu0 %1947, %v2035_v1  }
 0x10b   :  { %v130_v38 = vmul.f32 %v2257_v19, %v118_v32  ;;  %v131_v39 = vmul.f32 %v2260_v21, %v117_v31 }
 0x10d   :  { %v135_v40 = vpop.permute.xlu1 %134  ;;  %v133_v41 = vpop.permute.xlu0 %132  ;;  %v1743_v44 = vpack.c.bf16 %v131_v39, %v111_v37  ;;  %v1745_v45 = vpack.c.bf16 %v130_v38, %v110_v36  ;;  %1946 = vset.pattern.permute.xlu1 %v2001_v46  ;;  %v1703_v36 = vld [vmem:[%s3095_s2 + $0x11] ss:$8 sm:$0x3]  ;;  %v1704_v37 = vld [vmem:[%s3095_s2 + $0x12] ss:$8 sm:$0x3] }
 0x10e   :  { %v137_v47 = vsel %vm136_vm4, %v133_v41, %v135_v40  ;;  %v138_v51 = vsel %vm136_vm4, %v135_v40, %v133_v41  ;;  %1147 = vperm.xlu1 %1946, %v2035_v1   ;;  %v2348_v40 = vrot.slane %v1703_v36, %v2195_v49  ;;  %v2359_v46 = vrot.slane %v1704_v37, %v2195_v49 }
 0x10f   :  { %v150_v52 = vmul.f32 %v2268_v29, %v137_v47  ;;  %v151_v53 = vmul.f32 %v2276_v33, %v138_v51  ;;  %1744 = vmatprep.subr.bf16.mxu0 %v1743_v44  ;;  %v212_v44 = vld [vmem:[%s3096_s3] sm:$0xff]  ;;  %v2362_v47 = vrot.slane %v1704_v37, %v2197_v50 }
 0x110   :  { %1746 = vmatpush1.bf16.msra.mxu0 %v1745_v45  ;;  %v2355_v45 = vrot.slane %v1703_v36, %v2197_v50 }
 0x111   :  { %v155_v60 = vpop.permute.xlu1 %154  ;;  %v153_v61 = vpop.permute.xlu0 %152  ;;  %v1747_v62 = vpack.c.bf16 %v151_v53, %v2059_v18  ;;  %v1749_v63 = vpack.c.bf16 %v150_v52, %v2057_v17  ;;  %v1699_v17 = vld [vmem:[%s3095_s2 + $0x10] ss:$8 sm:$0x3] }
 0x112   :  { %1948 = vset.pattern.permute.xlu1 %v2002_v2  ;;  %v157_v18 = vsel %vm156_vm5, %v153_v61, %v155_v60  ;;  %v158_v6 = vsel %vm156_vm5, %v155_v60, %v153_v61  ;;  %v2326_v11 = vrot.slane %v1699_v17, %v2197_v50  ;;  %v2335_v30 = vrot.slane %v1699_v17, %v2195_v49  ;;  %v1705_v17 = vld [vmem:[%s3095_s2 + $0x13] ss:$8 sm:$0x3] }
 0x113   :  { %1748 = vmatprep.subr.bf16.mxu0 %v1747_v62  ;;  %1552 = vperm.xlu1 %1948, %v2035_v1   ;;  %v170_v1 = vmul.f32 %v2300_v0, %v157_v18  ;;  %v171_v12 = vmul.f32 %v2303_v3, %v158_v6  ;;  %v1706_v18 = vld [vmem:[%s3095_s2 + $0x14] ss:$8 sm:$0x3] }
 0x114   :  { %1750 = vmatpush1.bf16.msra.mxu0 %v1749_v63 }
 0x115   :  { %v175_v7 = vpop.permute.xlu1 %174  ;;  %v173_v8 = vpop.permute.xlu0 %172 }
 0x116   :  { %v177_v9 = vsel %vm176_vm6, %v173_v8, %v175_v7  ;;  %v178_v10 = vsel %vm176_vm6, %v175_v7, %v173_v8 }
 0x117   :  { %v190_v13 = vmul.f32 %v2307_v4, %v177_v9  ;;  %v191_v15 = vmul.f32 %v2310_v5, %v178_v10  ;;  %v2386_v10 = vrot.slane %v1705_v17, %v2195_v49 }
 0x119   :  { %v195_v22 = vpop.permute.xlu1 %194  ;;  %v193_v23 = vpop.permute.xlu0 %192  ;;  %v1751_v24 = vpack.c.bf16 %v191_v15, %v171_v12  ;;  %v1753_v25 = vpack.c.bf16 %v190_v13, %v170_v1  ;;  %v2389_v1 = vrot.slane %v1705_v17, %v2197_v50  ;;  %v2393_v12 = vrot.slane %v1706_v18, %v2195_v49  ;;  %v1707_v15 = vld [vmem:[%s3095_s2 + $0x16] ss:$8 sm:$0x3] }
 0x11a   :  { %v198_v28 = vsel %vm196_vm7, %v195_v22, %v193_v23  ;;  %v197_v31 = vsel %vm196_vm7, %v193_v23, %v195_v22  ;;  %v2396_v13 = vrot.slane %v1706_v18, %v2197_v50  ;;  %v2414_v36 = vrot.slane %v1707_v15, %v2197_v50 }
 0x11b   :  { %1752 = vmatprep.subr.bf16.mxu0 %v1751_v24  ;;  %v211_v32 = vmul.f32 %v2326_v11, %v198_v28  ;;  %v210_v41 = vmul.f32 %v2335_v30, %v197_v31 }
 0x11c   :  { %1754 = vmatpush1.bf16.msra.mxu0 %v1753_v25 }
 0x11d   :  { %v481_v38 = vpop.permute.xlu1 %480  ;;  %233 = vmatprep.subr.mxu0 %v211_v32  ;;  %v479_v39 = vpop.permute.xlu0 %478  ;;  %v2411_v32 = vrot.slane %v1707_v15, %v2195_v49  ;;  %v1710_v15 = vld [vmem:[%s3095_s2 + $0x21] ss:$8 sm:$0x3] }
 0x11e   :  { %v483_v51 = vsel %vm482_vm8, %v479_v39, %v481_v38  ;;  %v484_v52 = vsel %vm482_vm8, %v481_v38, %v479_v39 }
 0x11f   :  { %v496_v61 = vmul.f32 %v2348_v40, %v484_v52  ;;  %v497_v62 = vmul.f32 %v2355_v45, %v483_v51 }
 0x120   :  { %234 = vmatpush1.msra.mxu0 %v210_v41 }
 0x121   :  { %v501_v53 = vpop.permute.xlu1 %500  ;;  %1700 = vmatmul.mubr.msk.f32.vlgmr.msra.gmra.mrb[0].mxu0 %vm213_vm9, %v212_v44  ;;  %v499_v54 = vpop.permute.xlu0 %498 }
 0x122   :  { %v503_v57 = vsel %vm502_vm10, %v499_v54, %v501_v53  ;;  %v504_v60 = vsel %vm502_vm10, %v501_v53, %v499_v54  ;;  %707 = vmatprep.mubr.f32.mxu0 %v3122_v20 }
 0x123   :  { %v516_v63 = vmul.f32 %v2359_v46, %v504_v60  ;;  %v517_v2 = vmul.f32 %v2362_v47, %v503_v57 }
 0x125   :  { %v1773_v6 = vpack.c.bf16 %v516_v63, %v496_v61  ;;  %v521_v7 = vpop.permute.xlu1 %520  ;;  %v519_v8 = vpop.permute.xlu0 %518  ;;  %v1771_v9 = vpack.c.bf16 %v517_v2, %v497_v62  ;;  %v1708_v62 = vld [vmem:[%s3095_s2 + $0x17] ss:$8 sm:$0x3]  ;;  %v1709_v63 = vld [vmem:[%s3095_s2 + $0x20] ss:$8 sm:$0x3] }
 0x126   :  { %v523_v22 = vsel %vm522_vm11, %v519_v8, %v521_v7  ;;  %v524_v23 = vsel %vm522_vm11, %v521_v7, %v519_v8  ;;  %v2436_v7 = vrot.slane %v1708_v62, %v2195_v49  ;;  %v2439_v8 = vrot.slane %v1708_v62, %v2197_v50  ;;  %v1715_v62 = vld [vmem:[%s3095_s2 + $0x22] ss:$8 sm:$0x3] }
 0x127   :  { %1772 = vmatprep.subr.bf16.mxu0 %v1771_v9  ;;  %v536_v37 = vmul.f32 %v2386_v10, %v524_v23  ;;  %v537_v38 = vmul.f32 %v2389_v1, %v523_v22  ;;  %v2443_v9 = vrot.slane %v1709_v63, %v2195_v49 }
 0x128   :  { %1774 = vmatpush1.bf16.msra.mxu0 %v1773_v6 }
 0x129   :  { %v541_v24 = vpop.permute.xlu1 %540  ;;  %v539_v25 = vpop.permute.xlu0 %538 }
 0x12a   :  { %v543_v28 = vsel %vm542_vm12, %v539_v25, %v541_v24  ;;  %v544_v31 = vsel %vm542_vm12, %v541_v24, %v539_v25 }
 0x12b   :  { %v556_v39 = vmul.f32 %v2393_v12, %v544_v31  ;;  %v557_v41 = vmul.f32 %v2396_v13, %v543_v28  ;;  %v2461_v31 = vrot.slane %v1710_v15, %v2197_v50 }
 0x12d   :  { %v1777_v44 = vpack.c.bf16 %v556_v39, %v536_v37  ;;  %v561_v51 = vpop.permute.xlu1 %560  ;;  %v559_v52 = vpop.permute.xlu0 %558  ;;  %v1775_v53 = vpack.c.bf16 %v557_v41, %v537_v38  ;;  %3158 = vst [vmem:[#allocation2_spill] sm:$0xff] %v2461_v31 }
 0x12e   :  { %v563_v54 = vsel %vm3116_vm13, %v559_v52, %v561_v51  ;;  %v564_v57 = vsel %vm3116_vm13, %v561_v51, %v559_v52  ;;  %vm3118_vm13 = vcmp.lt.s32.totalorder %v2193_v48, 94 }
 0x12f   :  { %v576_v60 = vmul.f32 %v2411_v32, %v563_v54  ;;  %v577_v61 = vmul.f32 %v2414_v36, %v564_v57  ;;  %1776 = vmatprep.subr.bf16.mxu0 %v1775_v53  ;;  %v2468_v54 = vrot.slane %v1710_v15, %v2195_v49  ;;  %v1711_v15 = vld [vmem:[%s3096_s3 + $0x10] sm:$0xff] }
 0x130   :  { %1778 = vmatpush1.bf16.msra.mxu0 %v1777_v44 }
 0x131   :  { %v1781_v2 = vpack.c.bf16 %v576_v60, %v2097_v26  ;;  %v581_v17 = vpop.permute.xlu1 %580  ;;  %v579_v18 = vpop.permute.xlu0 %578  ;;  %v1779_v6 = vpack.c.bf16 %v577_v61, %v2099_v27  ;;  %v2446_v26 = vrot.slane %v1709_v63, %v2197_v50  ;;  %3159 = vst [vmem:[#allocation3_spill] sm:$0xff] %v2468_v54  ;;  %v1716_v63 = vld [vmem:[%s3095_s2 + $0x23] ss:$8 sm:$0x3] }
 0x132   :  { %v583_v27 = vsel %vm3121_vm14, %v579_v18, %v581_v17  ;;  %v584_v22 = vsel %vm3121_vm14, %v581_v17, %v579_v18  ;;  %vm3125_vm14 = vcmp.lt.s32.totalorder %v2193_v48, 125 }
 0x133   :  { %1780 = vmatprep.subr.bf16.mxu0 %v1779_v6  ;;  %v596_v37 = vmul.f32 %v2436_v7, %v583_v27  ;;  %v597_v38 = vmul.f32 %v2439_v8, %v584_v22  ;;  %v2484_v6 = vrot.slane %v1715_v62, %v2195_v49  ;;  %v2490_v27 = vrot.slane %v1715_v62, %v2197_v50 }
 0x134   :  { %1782 = vmatpush1.bf16.msra.mxu0 %v1781_v2  ;;  %v2494_v22 = vrot.slane %v1716_v63, %v2195_v49 }
 0x135   :  { %v601_v23 = vpop.permute.xlu1 %600  ;;  %v599_v24 = vpop.permute.xlu0 %598  ;;  %3160 = vst [vmem:[#allocation4_spill] sm:$0xff] %v2484_v6  ;;  %3161 = vst [vmem:[#allocation5_spill] sm:$0xff] %v2490_v27 }
 0x136   :  { %v603_v25 = vsel %vm3117_vm15, %v599_v24, %v601_v23  ;;  %v604_v28 = vsel %vm3117_vm15, %v601_v23, %v599_v24  ;;  %vm3120_vm15 = vcmp.lt.s32.totalorder %v2193_v48, 51  ;;  %3162 = vst [vmem:[#allocation6_spill] sm:$0xff] %v2494_v22  ;;  %v2497_v23 = vrot.slane %v1716_v63, %v2197_v50 }
 0x137   :  { %v616_v39 = vmul.f32 %v2443_v9, %v603_v25  ;;  %v617_v41 = vmul.f32 %v2446_v26, %v604_v28 }
 0x138   :  { %3163 = vst [vmem:[#allocation7_spill] sm:$0xff] %v2497_v23 }
 0x139   :  { %v1785_v44 = vpack.c.bf16 %v616_v39, %v596_v37  ;;  %v621_v51 = vpop.permute.xlu1 %620  ;;  %v619_v52 = vpop.permute.xlu0 %618  ;;  %v1783_v53 = vpack.c.bf16 %v617_v41, %v597_v38 }
 0x13a   :  { %v624_v57 = vsel %vm3118_vm13, %v621_v51, %v619_v52  ;;  %v623_v60 = vsel %vm3118_vm13, %v619_v52, %v621_v51  ;;  %vm3119_vm13 = vcmp.lt.s32.totalorder %v2193_v48, 48 }
 0x13b   :  { %v637_v61 = vmul.f32 %v2461_v31, %v624_v57  ;;  %1784 = vmatprep.subr.bf16.mxu0 %v1783_v53  ;;  %v636_v18 = vmul.f32 %v2468_v54, %v623_v60  ;;  %v1717_v53 = vld [vmem:[%s3095_s2 + $0x24] ss:$8 sm:$0x3]  ;;  %v1718_v57 = vld [vmem:[%s3095_s2 + $0x25] ss:$8 sm:$0x3] }
 0x13c   :  { %1786 = vmatpush1.bf16.msra.mxu0 %v1785_v44 }
 0x13d   :  { %v907_v2 = vpop.permute.xlu1 %906  ;;  %659 = vmatprep.subr.mxu0 %v637_v61  ;;  %v905_v17 = vpop.permute.xlu0 %904 }
 0x13e   :  { %v909_v24 = vsel %vm3120_vm15, %v905_v17, %v907_v2  ;;  %v910_v25 = vsel %vm3120_vm15, %v907_v2, %v905_v17  ;;  %v2521_v2 = vrot.slane %v1717_v53, %v2195_v49  ;;  %v2524_v17 = vrot.slane %v1717_v53, %v2197_v50 }
 0x13f   :  { %v922_v41 = vmul.f32 %v2484_v6, %v910_v25  ;;  %v923_v44 = vmul.f32 %v2490_v27, %v909_v24  ;;  %vm3124_vm15 = vcmp.lt.s32.totalorder %v2193_v48, 3  ;;  %v1719_v24 = vld [vmem:[%s3095_s2 + $0x27] ss:$8 sm:$0x3] }
 0x140   :  { %660 = vmatpush1.msra.mxu0 %v636_v18  ;;  %3164 = vst [vmem:[#allocation8_spill] sm:$0xff] %v2521_v2  ;;  %3165 = vst [vmem:[#allocation9_spill] sm:$0xff] %v2524_v17  ;;  %v2528_v18 = vrot.slane %v1718_v57, %v2195_v49 }
 0x141   :  { %v927_v28 = vpop.permute.xlu1 %926  ;;  %1712 = vmatmul.mubr.msk.f32.vlgmr.msra.gmra.mrb[2].mxu0 %vm213_vm9, %v1711_v15  ;;  %v925_v37 = vpop.permute.xlu0 %924  ;;  %v2531_v15 = vrot.slane %v1718_v57, %v2197_v50 }
 0x142   :  { %v929_v38 = vsel %vm3119_vm13, %v925_v37, %v927_v28  ;;  %v930_v39 = vsel %vm3119_vm13, %v927_v28, %v925_v37  ;;  %1133 = vmatprep.mubr.f32.mxu0 %v3122_v20  ;;  %vm3126_vm13 = vcmp.lt.s32.totalorder %v2193_v48, 45  ;;  %3166 = vst [vmem:[#allocation10_spill] sm:$0xff] %v2528_v18 }
 0x143   :  { %v942_v51 = vmul.f32 %v2494_v22, %v930_v39  ;;  %v943_v52 = vmul.f32 %v2497_v23, %v929_v38  ;;  %3167 = vst [vmem:[#allocation11_spill] sm:$0xff] %v2531_v15 }
 0x145   :  { %v1805_v60 = vpack.c.bf16 %v942_v51, %v922_v41  ;;  %v947_v61 = vpop.permute.xlu1 %946  ;;  %v945_v62 = vpop.permute.xlu0 %944  ;;  %v1803_v63 = vpack.c.bf16 %v943_v52, %v923_v44  ;;  %v2546_v44 = vrot.slane %v1719_v24, %v2195_v49  ;;  %v2549_v51 = vrot.slane %v1719_v24, %v2197_v50 }
 0x146   :  { %v949_v25 = vsel %vm3126_vm13, %v945_v62, %v947_v61  ;;  %v950_v28 = vsel %vm3126_vm13, %v947_v61, %v945_v62  ;;  %vm3132_vm13 = vcmp.lt.s32.totalorder %v2193_v48, 77 }
 0x147   :  { %1804 = vmatprep.subr.bf16.mxu0 %v1803_v63  ;;  %3168 = vst [vmem:[#allocation12_spill] sm:$0xff] %v2546_v44  ;;  %3169 = vst [vmem:[#allocation13_spill] sm:$0xff] %v2549_v51  ;;  %v962_v52 = vmul.f32 %v2521_v2, %v950_v28  ;;  %v963_v53 = vmul.f32 %v2524_v17, %v949_v25  ;;  %v1720_v25 = vld [vmem:[%s3095_s2 + $0x30] ss:$8 sm:$0x3] }
 0x148   :  { %1806 = vmatpush1.bf16.msra.mxu0 %v1805_v60 }
 0x149   :  { %v967_v37 = vpop.permute.xlu1 %966  ;;  %v965_v38 = vpop.permute.xlu0 %964 }
 0x14a   :  { %v969_v39 = vsel %vm3124_vm15, %v965_v38, %v967_v37  ;;  %v970_v41 = vsel %vm3124_vm15, %v967_v37, %v965_v38  ;;  %vm3144_vm15 = vcmp.lt.s32.totalorder %v2193_v48, 83 }
 0x14b   :  { %v982_v57 = vmul.f32 %v2528_v18, %v970_v41  ;;  %v983_v60 = vmul.f32 %v2531_v15, %v969_v39  ;;  %v1721_v39 = vld [vmem:[%s3095_s2 + $0x31] ss:$8 sm:$0x3] }
 0x14d   :  { %v1809_v61 = vpack.c.bf16 %v982_v57, %v962_v52  ;;  %v987_v62 = vpop.permute.xlu1 %986  ;;  %v985_v63 = vpop.permute.xlu0 %984  ;;  %v1807_v20 = vpack.c.bf16 %v983_v60, %v963_v53  ;;  %v2571_v60 = vrot.slane %v1720_v25, %v2195_v49 }
 0x14e   :  { %v989_v37 = vsel %vm3125_vm14, %v985_v63, %v987_v62  ;;  %v990_v38 = vsel %vm3125_vm14, %v987_v62, %v985_v63  ;;  %vm3131_vm14 = vcmp.lt.s32.totalorder %v2193_v48, 80  ;;  %v1722_v62 = vld [vmem:[%s3095_s2 + $0x32] ss:$8 sm:$0x3] }
 0x14f   :  { %v1002_v24 = vmul.f32 %v2546_v44, %v989_v37  ;;  %v1003_v28 = vmul.f32 %v2549_v51, %v990_v38  ;;  %1808 = vmatprep.subr.bf16.mxu0 %v1807_v20  ;;  %3170 = vst [vmem:[#allocation14_spill] sm:$0xff] %v2571_v60  ;;  %v2574_v20 = vrot.slane %v1720_v25, %v2197_v50 }
 0x150   :  { %1810 = vmatpush1.bf16.msra.mxu0 %v1809_v61  ;;  %v2578_v61 = vrot.slane %v1721_v39, %v2195_v49  ;;  %v2596_v25 = vrot.slane %v1722_v62, %v2197_v50  ;;  %v2603_v18 = vrot.slane %v1722_v62, %v2195_v49 }
 0x151   :  { %v1813_v41 = vpack.c.bf16 %v1002_v24, %v2131_v34  ;;  %v1007_v52 = vpop.permute.xlu1 %1006  ;;  %v1005_v53 = vpop.permute.xlu0 %1004  ;;  %v1811_v57 = vpack.c.bf16 %v1003_v28, %v2133_v35  ;;  %3171 = vst [vmem:[#allocation15_spill] sm:$0xff] %v2574_v20  ;;  %v2581_v34 = vrot.slane %v1721_v39, %v2197_v50 }
 0x152   :  { %3172 = vst [vmem:[#allocation16_spill] sm:$0xff] %v2578_v61  ;;  %v1009_v35 = vsel %vm3144_vm15, %v1005_v53, %v1007_v52  ;;  %v1010_v63 = vsel %vm3144_vm15, %v1007_v52, %v1005_v53  ;;  %3174 = vst [vmem:[#allocation18_spill] sm:$0xff] %v2596_v25  ;;  %vm1414_vm15 = vcmp.lt.s32.totalorder %v2193_v48, 124 }
 0x153   :  { %1812 = vmatprep.subr.bf16.mxu0 %v1811_v57  ;;  %3173 = vst [vmem:[#allocation17_spill] sm:$0xff] %v2581_v34  ;;  %v1022_v39 = vmul.f32 %v2571_v60, %v1009_v35  ;;  %v1023_v57 = vmul.f32 %v2574_v20, %v1010_v63  ;;  %3175 = vst [vmem:[#allocation19_spill] sm:$0xff] %v2603_v18  ;;  %v1727_v63 = vld [vmem:[%s3095_s2 + $0x33] ss:$8 sm:$0x3] }
 0x154   :  { %1814 = vmatpush1.bf16.msra.mxu0 %v1813_v41 }
 0x155   :  { %v1027_v37 = vpop.permute.xlu1 %1026  ;;  %v1025_v38 = vpop.permute.xlu0 %1024 }
 0x156   :  { %v1029_v24 = vsel %vm3131_vm14, %v1025_v38, %v1027_v37  ;;  %v1030_v28 = vsel %vm3131_vm14, %v1027_v37, %v1025_v38  ;;  %vm3141_vm14 = vcmp.lt.s32.totalorder %v2193_v48, 68 }
 0x157   :  { %v1042_v52 = vmul.f32 %v2578_v61, %v1029_v24  ;;  %v1043_v41 = vmul.f32 %v2581_v34, %v1030_v28  ;;  %v1728_v24 = vld [vmem:[%s3095_s2 + $0x34] ss:$8 sm:$0x3] }
 0x159   :  { %v1817_v53 = vpack.c.bf16 %v1042_v52, %v1022_v39  ;;  %v1047_v51 = vpop.permute.xlu1 %1046  ;;  %v1045_v44 = vpop.permute.xlu0 %1044  ;;  %v1815_v15 = vpack.c.bf16 %v1043_v41, %v1023_v57  ;;  %v2629_v57 = vrot.slane %v1728_v24, %v2195_v49  ;;  %v2632_v52 = vrot.slane %v1728_v24, %v2197_v50 }
 0x15a   :  { %v1050_v37 = vsel %vm3132_vm13, %v1047_v51, %v1045_v44  ;;  %v1049_v38 = vsel %vm3132_vm13, %v1045_v44, %v1047_v51  ;;  %v2619_v44 = vrot.slane %v1727_v63, %v2195_v49  ;;  %v2625_v51 = vrot.slane %v1727_v63, %v2197_v50 }
 0x15b   :  { %v1063_v35 = vmul.f32 %v2596_v25, %v1050_v37  ;;  %1816 = vmatprep.subr.bf16.mxu0 %v1815_v15  ;;  %v1062_v39 = vmul.f32 %v2603_v18, %v1049_v38  ;;  %v1723_v15 = vld [vmem:[%s3096_s3 + $0x20] sm:$0xff]  ;;  %vm3135_vm13 = vcmp.lt.s32.totalorder %v2193_v48, 64  ;;  %3178 = vst [vmem:[#allocation22_spill] sm:$0xff] %v2629_v57  ;;  %3179 = vst [vmem:[#allocation23_spill] sm:$0xff] %v2632_v52  ;;  %v3180_v24 = vmov 0.0  }
 0x15c   :  { %1818 = vmatpush1.bf16.msra.mxu0 %v1817_v53  ;;  %3176 = vst [vmem:[#allocation20_spill] sm:$0xff] %v2619_v44  ;;  %3177 = vst [vmem:[#allocation21_spill] sm:$0xff] %v2625_v51 }
 0x15d   :  { %v1333_v62 = vpop.permute.xlu1 %1332  ;;  %1085 = vmatprep.subr.mxu0 %v1063_v35  ;;  %v1331_v28 = vpop.permute.xlu0 %1330 }
 0x15e   :  { %v2636_v41 = vsel %vm3141_vm14, %v1331_v28, %v1333_v62  ;;  %v1336_v53 = vsel %vm3141_vm14, %v1333_v62, %v1331_v28  ;;  %vm1394_vm14 = vcmp.lt.s32.totalorder %v2193_v48, 4 }
 0x15f   :  { %v1348_v18 = vmul.f32 %v2619_v44, %v1336_v53  ;;  %v1349_v25 = vmul.f32 %v2625_v51, %v2636_v41 }
 0x160   :  { %1086 = vmatpush1.msra.mxu0 %v1062_v39  ;;  %v1729_v39 = vld [vmem:[%s3095_s2 + $0x35] ss:$8 sm:$0x3] }
 0x161   :  { %v1353_v37 = vpop.permute.xlu1 %1352  ;;  %1724 = vmatmul.mubr.msk.f32.vlgmr.msra.gmra.mrb[4].mxu0 %vm213_vm9, %v1723_v15  ;;  %v1351_v38 = vpop.permute.xlu0 %1350  ;;  %v1730_v15 = vld [vmem:[%s3095_s2 + $0x36] ss:$8 sm:$0x3]  ;;  %v2665_v51 = vrot.slane %v1729_v39, %v2197_v50 }
 0x162   :  { %v1355_v35 = vsel %vm3135_vm13, %v1351_v38, %v1353_v37  ;;  %v1356_v63 = vsel %vm3135_vm13, %v1353_v37, %v1351_v38  ;;  %1538 = vmatprep.mubr.f32.mxu0 %v3180_v24  ;;  %vm1374_vm13 = vcmp.lt.s32.totalorder %v2193_v48, 60 }
 0x163   :  { %v1368_v62 = vmul.f32 %v2629_v57, %v1356_v63  ;;  %v1369_v28 = vmul.f32 %v2632_v52, %v1355_v35  ;;  %v1733_v57 = vld [vmem:[%s3095_s2 + $0x42] ss:$8 sm:$0x3]  ;;  %v2662_v52 = vrot.slane %v1729_v39, %v2195_v49  ;;  %3181 = vst [vmem:[#allocation24_spill] sm:$0xff] %v2665_v51 }
 0x164   :  { %v2706_v31 = vrot.slane %v1733_v57, %v2195_v49 }
 0x165   :  { %v1837_v37 = vpack.c.bf16 %v1368_v62, %v1348_v18  ;;  %v1373_v38 = vpop.permute.xlu1 %1372  ;;  %v1371_v44 = vpop.permute.xlu0 %1370  ;;  %v1835_v34 = vpack.c.bf16 %v1369_v28, %v1349_v25  ;;  %v2669_v18 = vrot.slane %v1730_v15, %v2195_v49  ;;  %v2672_v62 = vrot.slane %v1730_v15, %v2197_v50  ;;  %v1731_v25 = vld [vmem:[%s3095_s2 + $0x40] ss:$8 sm:$0x3]  ;;  %v1732_v15 = vld [vmem:[%s3095_s2 + $0x41] ss:$8 sm:$0x3] }
 0x166   :  { %v1375_v28 = vsel %vm1374_vm13, %v1371_v44, %v1373_v38  ;;  %v1376_v39 = vsel %vm1374_vm13, %v1373_v38, %v1371_v44  ;;  %v2693_v44 = vrot.slane %v1731_v25, %v2195_v49  ;;  %v2703_v27 = vrot.slane %v1732_v15, %v2197_v50 }
 0x167   :  { %1836 = vmatprep.subr.bf16.mxu0 %v1835_v34  ;;  %3182 = vst [vmem:[#allocation25_spill] sm:$0xff] %v2672_v62  ;;  %v2682_v34 = vrot.slane %v1733_v57, %v2197_v50  ;;  %v1388_v38 = vmul.f32 %v2662_v52, %v1376_v39  ;;  %v1389_v2 = vmul.f32 %v2665_v51, %v1375_v28 }
 0x168   :  { %1838 = vmatpush1.bf16.msra.mxu0 %v1837_v37  ;;  %v2696_v37 = vrot.slane %v1731_v25, %v2197_v50 }
 0x169   :  { %v1393_v61 = vpop.permute.xlu1 %1392  ;;  %v1391_v20 = vpop.permute.xlu0 %1390 }
 0x16a   :  { %v1395_v60 = vsel %vm1394_vm14, %v1391_v20, %v1393_v61  ;;  %v1396_v17 = vsel %vm1394_vm14, %v1393_v61, %v1391_v20 }
 0x16b   :  { %v1408_v23 = vmul.f32 %v2669_v18, %v1396_v17  ;;  %v1409_v22 = vmul.f32 %v2672_v62, %v1395_v60  ;;  %v1455_v17 = vmul.f32 %v2682_v34, %v1356_v63  ;;  %v1454_v63 = vmul.f32 %v2706_v31, %v1355_v35 }
 0x16d   :  { %v1841_v6 = vpack.c.bf16 %v1408_v23, %v1388_v38  ;;  %v1413_v54 = vpop.permute.xlu1 %1412  ;;  %v1411_v20 = vpop.permute.xlu0 %1410  ;;  %v1839_v61 = vpack.c.bf16 %v1409_v22, %v1389_v2  ;;  %v2716_v23 = vrot.slane %v1732_v15, %v2195_v49  ;;  %v1734_v22 = vld [vmem:[%s3095_s2 + $0x43] ss:$8 sm:$0x3]  ;;  %v1442_v2 = vmul.f32 %v2703_v27, %v1336_v53 }
 0x16e   :  { %v1415_v25 = vsel %vm1414_vm15, %v1411_v20, %v1413_v54  ;;  %v1416_v51 = vsel %vm1414_vm15, %v1413_v54, %v1411_v20  ;;  %v2726_v38 = vrot.slane %v1734_v22, %v2197_v50  ;;  %v1735_v50 = vld [vmem:[%s3096_s3 + $0x30] sm:$0xff] }
 0x16f   :  { %v1428_v60 = vmul.f32 %v2693_v44, %v1415_v25  ;;  %v1429_v62 = vmul.f32 %v2696_v37, %v1416_v51  ;;  %1840 = vmatprep.subr.bf16.mxu0 %v1839_v61  ;;  %v1847_v51 = vpack.c.bf16 %v1455_v17, %v1442_v2  ;;  %v1441_v15 = vmul.f32 %v2716_v23, %v2636_v41 }
 0x170   :  { %1842 = vmatpush1.bf16.msra.mxu0 %v1841_v6  ;;  %3183 = vst [vmem:[#allocation26_spill] sm:$0xff] %v2726_v38  ;;  %v2731_v6 = vrot.slane %v1734_v22, %v2195_v49 }
 0x171   :  { %v1845_v57 = vpack.c.bf16 %v1428_v60, %v2169_v42  ;;  %v1843_v54 = vpack.c.bf16 %v1429_v62, %v2171_v43  ;;  %v1849_v20 = vpack.c.bf16 %v1454_v63, %v1441_v15  ;;  %v1468_v42 = vmul.f32 %v2726_v38, %v1376_v39 }
 0x172   :  { %3184 = vst [vmem:[#allocation27_spill] sm:$0xff] %v2731_v6  ;;  %v1467_v43 = vmul.f32 %v2731_v6, %v1375_v28  ;;  %v2006_v6 = vmov 19  }
 0x173   :  { %1844 = vmatprep.subr.bf16.mxu0 %v1843_v54 }
 0x174   :  { %1846 = vmatpush1.bf16.msra.mxu0 %v1845_v57 }
 0x175   :  { %1848 = vmatprep.subr.bf16.mxu0 %v1847_v51 }
 0x178   :  { %1850 = vmatpush1.bf16.msra.mxu0 %v1849_v20 }
 0x179   :  { %1490 = vmatprep.subr.mxu0 %v1468_v42 }
 0x17c   :  { %1491 = vmatpush1.msra.mxu0 %v1467_v43 }
 0x17d   :  { %1736 = vmatmul.mubr.msk.f32.vlgmr.msra.gmra.mrb[6].mxu0 %vm213_vm9, %v1735_v50 }
 0x17e   :  { %v290_v41 = vpop.permute.xlu0 %289  ;;  %v296_v35 = vpop.permute.xlu1 %295 }
 0x183   :  { %v716_v28 = vpop.permute.xlu1 %715  ;;  %v722_v2 = vpop.permute.xlu0 %721 }
 0x188   :  { %v1142_v43 = vpop.permute.xlu1 %1141 }
 0x1f4   :  { %v283_v53 = vpop.f32.mrb[0].mxu0 }
 0x1f5   :  { %v292_v62 = vmul.f32 %v290_v41, %v283_v53  ;;  %v285_v61 = vpop.f32.mrb[1].mxu0 }
 0x1f6   :  { %v293_v49 = vmul.f32 %v290_v41, %v285_v61  ;;  %v1148_v41 = vpop.permute.xlu1 %1147 }
 0x1f7   :  { %v298_v25 = vadd.f32 %v296_v35, %v292_v62 }
 0x1f8   :  { %v299_v17 = vadd.f32 %v296_v35, %v293_v49 }
 0x1f9   :  { %v2739_v39 = vmax.f32 %v298_v25, 0.0 }
 0x1fa   :  { %v2741_v60 = vmax.f32 %v299_v17, 0.0 }
 0x1fb   :  { %302 = vrot.lane.b32.xlu1 %v2739_v39, %s1965_s21 }
 0x1fc   :  { %304 = vrot.lane.b32.xlu0 %v2741_v60, %s1965_s21  ;;  %s3185_s21 = smov 125  }
 0x1ff   :  { %310 = vrot.lane.b32.xlu1 %v2739_v39, %s1966_s22 }
 0x200   :  { %312 = vrot.lane.b32.xlu0 %v2741_v60, %s1966_s22  ;;  %s3186_s22 = smov 83  }
 0x203   :  { %318 = vrot.lane.b32.xlu1 %v2739_v39, %s1967_s23 }
 0x204   :  { %320 = vrot.lane.b32.xlu0 %v2741_v60, %s1967_s23  ;;  %s3187_s23 = smov 80  }
 0x207   :  { %326 = vrot.lane.b32.xlu1 %v2739_v39, %s1968_s24 }
 0x208   :  { %328 = vrot.lane.b32.xlu0 %v2741_v60, %s1968_s24  ;;  %s3188_s24 = smov 77  }
 0x20b   :  { %334 = vrot.lane.b32.xlu1 %v2739_v39, %s1969_s25 }
 0x20c   :  { %336 = vrot.lane.b32.xlu0 %v2741_v60, %s1969_s25  ;;  %s3189_s25 = smov 68  }
 0x20f   :  { %342 = vrot.lane.b32.xlu1 %v2739_v39, %s1970_s26 }
 0x210   :  { %344 = vrot.lane.b32.xlu0 %v2741_v60, %s1970_s26  ;;  %s3190_s26 = smov 64  }
 0x213   :  { %350 = vrot.lane.b32.xlu1 %v2739_v39, %s1972_s27 }
 0x214   :  { %v709_v22 = vpop.f32.mrb[2].mxu0  ;;  %352 = vrot.lane.b32.xlu0 %v2741_v60, %s1972_s27  ;;  %s3191_s27 = smov 60  }
 0x215   :  { %v718_v57 = vmul.f32 %v716_v28, %v709_v22  ;;  %v711_v54 = vpop.f32.mrb[3].mxu0 }
 0x216   :  { %v719_v63 = vmul.f32 %v716_v28, %v711_v54  ;;  %v1547_v28 = vpop.permute.xlu0 %1546 }
 0x217   :  { %v724_v51 = vadd.f32 %v722_v2, %v718_v57  ;;  %358 = vrot.lane.b32.xlu1 %v2739_v39, %s1973_s28 }
 0x218   :  { %v725_v15 = vadd.f32 %v722_v2, %v719_v63  ;;  %360 = vrot.lane.b32.xlu0 %v2741_v60, %s1973_s28  ;;  %v1553_v2 = vpop.permute.xlu1 %1552  ;;  %s3192_s28 = smov 4  }
 0x219   :  { %v2775_v20 = vmax.f32 %v724_v51, 0.0 }
 0x21a   :  { %v2777_v42 = vmax.f32 %v725_v15, 0.0 }
 0x21b   :  { %728 = vrot.lane.b32.xlu1 %v2775_v20, %s1974_s29 }
 0x21c   :  { %730 = vrot.lane.b32.xlu0 %v2777_v42, %s1974_s29  ;;  %s3193_s29 = smov 124  }
 0x21f   :  { %736 = vrot.lane.b32.xlu1 %v2775_v20, %s1975_s30 }
 0x220   :  { %738 = vrot.lane.b32.xlu0 %v2777_v42, %s1975_s30 }
 0x223   :  { %744 = vrot.lane.b32.xlu1 %v2775_v20, %s1976_s5 }
 0x224   :  { %746 = vrot.lane.b32.xlu0 %v2777_v42, %s1976_s5 }
 0x227   :  { %752 = vrot.lane.b32.xlu1 %v2775_v20, %s1977_s6 }
 0x228   :  { %754 = vrot.lane.b32.xlu0 %v2777_v42, %s1977_s6 }
 0x22b   :  { %760 = vrot.lane.b32.xlu1 %v2775_v20, %s1978_s7 }
 0x22c   :  { %762 = vrot.lane.b32.xlu0 %v2777_v42, %s1978_s7 }
 0x22f   :  { %768 = vrot.lane.b32.xlu1 %v2775_v20, %s1979_s8 }
 0x230   :  { %770 = vrot.lane.b32.xlu0 %v2777_v42, %s1979_s8 }
 0x233   :  { %776 = vrot.lane.b32.xlu1 %v2775_v20, %s1980_s9 }
 0x234   :  { %v1135_v50 = vpop.f32.mrb[4].mxu0  ;;  %778 = vrot.lane.b32.xlu0 %v2777_v42, %s1980_s9 }
 0x235   :  { %v1144_v53 = vmul.f32 %v1142_v43, %v1135_v50  ;;  %v1137_v35 = vpop.f32.mrb[5].mxu0 }
 0x236   :  { %v1145_v62 = vmul.f32 %v1142_v43, %v1137_v35  ;;  %v2003_v35 = vmov 4  }
 0x237   :  { %v1150_v61 = vadd.f32 %v1148_v41, %v1144_v53  ;;  %784 = vrot.lane.b32.xlu1 %v2775_v20, %s1981_s10 }
 0x238   :  { %v1151_v49 = vadd.f32 %v1148_v41, %v1145_v62  ;;  %786 = vrot.lane.b32.xlu0 %v2777_v42, %s1981_s10  ;;  %1949 = vset.pattern.permute.xlu1 %v2003_v35  ;;  %v2004_v62 = vmov 9  }
 0x239   :  { %v2811_v25 = vmax.f32 %v1150_v61, 0.0  ;;  %1950 = vset.pattern.permute.xlu0 %v2004_v62  ;;  %v2005_v62 = vmov 14  }
 0x23a   :  { %v2813_v17 = vmax.f32 %v1151_v49, 0.0  ;;  %v1954_v49 = vld [vmem:[%s3093_s1] sm:$0xff] }
 0x23b   :  { %1154 = vrot.lane.b32.xlu1 %v2811_v25, %s1982_s11 }
 0x23c   :  { %1156 = vrot.lane.b32.xlu0 %v2813_v17, %s1982_s11 }
 0x23f   :  { %1162 = vrot.lane.b32.xlu1 %v2811_v25, %s1983_s12 }
 0x240   :  { %1164 = vrot.lane.b32.xlu0 %v2813_v17, %s1983_s12 }
 0x243   :  { %1170 = vrot.lane.b32.xlu1 %v2811_v25, %s1984_s13 }
 0x244   :  { %1172 = vrot.lane.b32.xlu0 %v2813_v17, %s1984_s13 }
 0x247   :  { %1178 = vrot.lane.b32.xlu1 %v2811_v25, %s1985_s14 }
 0x248   :  { %1180 = vrot.lane.b32.xlu0 %v2813_v17, %s1985_s14 }
 0x24b   :  { %1186 = vrot.lane.b32.xlu1 %v2811_v25, %s3185_s21 }
 0x24c   :  { %1188 = vrot.lane.b32.xlu0 %v2813_v17, %s3185_s21 }
 0x24f   :  { %1194 = vrot.lane.b32.xlu1 %v2811_v25, %s3186_s22 }
 0x250   :  { %1196 = vrot.lane.b32.xlu0 %v2813_v17, %s3186_s22  ;;  %v1540_v22 = vpop.f32.mrb[6].mxu0 }
 0x251   :  { %v1542_v57 = vpop.f32.mrb[7].mxu0  ;;  %v1549_v54 = vmul.f32 %v1547_v28, %v1540_v22 }
 0x252   :  { %v1550_v63 = vmul.f32 %v1547_v28, %v1542_v57 }
 0x253   :  { %1202 = vrot.lane.b32.xlu1 %v2811_v25, %s3187_s23  ;;  %v1555_v51 = vadd.f32 %v1553_v2, %v1549_v54 }
 0x254   :  { %1204 = vrot.lane.b32.xlu0 %v2813_v17, %s3187_s23  ;;  %v1556_v15 = vadd.f32 %v1553_v2, %v1550_v63 }
 0x255   :  { %v2843_v43 = vmax.f32 %v1555_v51, 0.0 }
 0x256   :  { %v2847_v50 = vmax.f32 %v1556_v15, 0.0 }
 0x257   :  { %1210 = vrot.lane.b32.xlu1 %v2811_v25, %s3188_s24 }
 0x258   :  { %1212 = vrot.lane.b32.xlu0 %v2813_v17, %s3188_s24 }
 0x25b   :  { %1559 = vrot.lane.b32.xlu1 %v2843_v43, %s3189_s25 }
 0x25c   :  { %1561 = vrot.lane.b32.xlu0 %v2847_v50, %s3189_s25 }
 0x25f   :  { %1567 = vrot.lane.b32.xlu1 %v2843_v43, %s3190_s26 }
 0x260   :  { %1569 = vrot.lane.b32.xlu0 %v2847_v50, %s3190_s26 }
 0x263   :  { %1575 = vrot.lane.b32.xlu1 %v2843_v43, %s3191_s27 }
 0x264   :  { %1577 = vrot.lane.b32.xlu0 %v2847_v50, %s3191_s27 }
 0x267   :  { %1583 = vrot.lane.b32.xlu1 %v2843_v43, %s3192_s28 }
 0x268   :  { %1585 = vrot.lane.b32.xlu0 %v2847_v50, %s3192_s28 }
 0x26b   :  { %1591 = vrot.lane.b32.xlu1 %v2843_v43, %s3193_s29 }
 0x26c   :  { %1593 = vrot.lane.b32.xlu0 %v2847_v50, %s3193_s29 }
 0x26d   :  { %v303_v41 = vpop.permute.xlu1 %302 }
 0x26e   :  { %v305_v53 = vpop.permute.xlu0 %304 }
 0x26f   :  { %v307_v61 = vsel %vm56_vm0, %v305_v53, %v303_v41  ;;  %369 = vperm.xlu1 %1949, %v1954_v49   ;;  %v306_v28 = vsel %vm56_vm0, %v303_v41, %v305_v53  ;;  %vm3194_vm0 = vcmp.lt.s32.totalorder %v2193_v48, 126 }
 0x270   :  { %795 = vperm.xlu0 %1950, %v1954_v49   ;;  %v308_v57 = vmul.f32 %v307_v61, %v2214_v56  ;;  %v309_v15 = vmul.f32 %v306_v28, %v2211_v55 }
 0x271   :  { %v311_v22 = vpop.permute.xlu1 %310 }
 0x272   :  { %v313_v2 = vpop.permute.xlu0 %312 }
 0x273   :  { %v314_v54 = vsel %vm76_vm1, %v311_v22, %v313_v2  ;;  %v315_v63 = vsel %vm76_vm1, %v313_v2, %v311_v22  ;;  %1951 = vset.pattern.permute.xlu1 %v2005_v62  ;;  %vm3195_vm1 = vmmov %vm3194_vm0 }
 0x274   :  { %v316_v51 = vmul.f32 %v315_v63, %v2223_v59  ;;  %v317_v35 = vmul.f32 %v314_v54, %v2220_v58  ;;  %1953 = vset.pattern.permute.xlu0 %v2006_v6  ;;  %1221 = vperm.xlu1 %1951, %v1954_v49  }
 0x275   :  { %v319_v41 = vpop.permute.xlu1 %318 }
 0x276   :  { %v321_v53 = vpop.permute.xlu0 %320  ;;  %v1755_v56 = vpack.c.bf16 %v317_v35, %v309_v15  ;;  %v1757_v61 = vpack.c.bf16 %v316_v51, %v308_v57 }
 0x277   :  { %v322_v38 = vsel %vm96_vm2, %v319_v41, %v321_v53  ;;  %v323_v59 = vsel %vm96_vm2, %v321_v53, %v319_v41  ;;  %vm3196_vm2 = vcmp.lt.s32.totalorder %v2193_v48, 98 }
 0x278   :  { %1756 = vmatprep.subr.bf16.mxu1 %v1755_v56  ;;  %1952 = vset.pattern.permute.xlu1 %v2006_v6  ;;  %v324_v2 = vmul.f32 %v323_v59, %v2247_v14  ;;  %v325_v57 = vmul.f32 %v322_v38, %v2253_v16 }
 0x279   :  { %v327_v22 = vpop.permute.xlu1 %326  ;;  %1758 = vmatpush1.bf16.msra.mxu1 %v1757_v61  ;;  %1608 = vperm.xlu1 %1952, %v1954_v49  }
 0x27a   :  { %v329_v55 = vpop.permute.xlu0 %328 }
 0x27b   :  { %v330_v58 = vsel %vm116_vm3, %v327_v22, %v329_v55  ;;  %v331_v28 = vsel %vm116_vm3, %v329_v55, %v327_v22  ;;  %vm3197_vm3 = vmmov %vm3196_vm2 }
 0x27c   :  { %v332_v54 = vmul.f32 %v331_v28, %v2257_v19  ;;  %v333_v63 = vmul.f32 %v330_v58, %v2260_v21 }
 0x27d   :  { %v335_v51 = vpop.permute.xlu1 %334 }
 0x27e   :  { %v337_v15 = vpop.permute.xlu0 %336  ;;  %v1759_v35 = vpack.c.bf16 %v333_v63, %v325_v57  ;;  %v1761_v6 = vpack.c.bf16 %v332_v54, %v324_v2 }
 0x27f   :  { %v338_v49 = vsel %vm136_vm4, %v335_v51, %v337_v15  ;;  %v339_v62 = vsel %vm136_vm4, %v337_v15, %v335_v51  ;;  %vm3198_vm4 = vcmp.lt.s32.totalorder %v2193_v48, 96 }
 0x280   :  { %v340_v41 = vmul.f32 %v338_v49, %v2268_v29  ;;  %v341_v14 = vmul.f32 %v339_v62, %v2276_v33  ;;  %1760 = vmatprep.subr.bf16.mxu1 %v1759_v35 }
 0x281   :  { %v343_v16 = vpop.permute.xlu1 %342  ;;  %1762 = vmatpush1.bf16.msra.mxu1 %v1761_v6 }
 0x282   :  { %v345_v19 = vpop.permute.xlu0 %344  ;;  %v1763_v21 = vpack.c.bf16 %v341_v14, %v2741_v60  ;;  %v1765_v38 = vpack.c.bf16 %v340_v41, %v2739_v39 }
 0x283   :  { %v346_v53 = vsel %vm156_vm5, %v343_v16, %v345_v19  ;;  %v347_v56 = vsel %vm156_vm5, %v345_v19, %v343_v16  ;;  %vm3199_vm5 = vmmov %vm3198_vm4 }
 0x284   :  { %1764 = vmatprep.subr.bf16.mxu1 %v1763_v21  ;;  %v348_v60 = vmul.f32 %v346_v53, %v2300_v0  ;;  %v349_v39 = vmul.f32 %v347_v56, %v2303_v3 }
 0x285   :  { %v351_v61 = vpop.permute.xlu1 %350  ;;  %1766 = vmatpush1.bf16.msra.mxu1 %v1765_v38 }
 0x286   :  { %v353_v29 = vpop.permute.xlu0 %352 }
 0x287   :  { %v354_v33 = vsel %vm176_vm6, %v351_v61, %v353_v29  ;;  %v355_v59 = vsel %vm176_vm6, %v353_v29, %v351_v61  ;;  %vm3200_vm6 = vcmp.lt.s32.totalorder %v2193_v48, 94 }
 0x288   :  { %v356_v22 = vmul.f32 %v354_v33, %v2307_v4  ;;  %v357_v55 = vmul.f32 %v355_v59, %v2310_v5  ;;  %v1701_v5 = vld [vmem:[%s3096_s3 + $0x8] sm:$0xff] }
 0x289   :  { %v359_v58 = vpop.permute.xlu1 %358 }
 0x28a   :  { %v361_v28 = vpop.permute.xlu0 %360  ;;  %v1767_v2 = vpack.c.bf16 %v357_v55, %v349_v39  ;;  %v1769_v57 = vpack.c.bf16 %v356_v22, %v348_v60 }
 0x28b   :  { %v363_v54 = vsel %vm196_vm7, %v361_v28, %v359_v58  ;;  %v362_v63 = vsel %vm196_vm7, %v359_v58, %v361_v28  ;;  %vm3201_vm7 = vmmov %vm3200_vm6 }
 0x28c   :  { %v365_v51 = vmul.f32 %v363_v54, %v2326_v11  ;;  %1768 = vmatprep.subr.bf16.mxu1 %v1767_v2  ;;  %v364_v4 = vmul.f32 %v362_v63, %v2335_v30 }
 0x28d   :  { %v729_v0 = vpop.permute.xlu1 %728  ;;  %1770 = vmatpush1.bf16.msra.mxu1 %v1769_v57 }
 0x28e   :  { %391 = vmatprep.subr.mxu1 %v365_v51  ;;  %v731_v3 = vpop.permute.xlu0 %730 }
 0x28f   :  { %v732_v15 = vsel %vm482_vm8, %v729_v0, %v731_v3  ;;  %v733_v35 = vsel %vm482_vm8, %v731_v3, %v729_v0  ;;  %vm3204_vm8 = vcmp.lt.s32.totalorder %v2193_v48, 51 }
 0x290   :  { %v734_v62 = vmul.f32 %v733_v35, %v2348_v40  ;;  %v735_v41 = vmul.f32 %v732_v15, %v2355_v45 }
 0x291   :  { %v737_v6 = vpop.permute.xlu1 %736  ;;  %392 = vmatpush1.msra.mxu1 %v364_v4 }
 0x292   :  { %v739_v11 = vpop.permute.xlu0 %738  ;;  %1702 = vmatmul.mubr.msk.f32.vlgmr.msra.gmra.mrb[0].mxu1 %vm213_vm9, %v1701_v5 }
 0x293   :  { %v740_v49 = vsel %vm502_vm10, %v737_v6, %v739_v11  ;;  %v741_v30 = vsel %vm502_vm10, %v739_v11, %v737_v6  ;;  %865 = vmatprep.mubr.f32.mxu1 %v3180_v24  ;;  %vm3205_vm10 = vmmov %vm3204_vm8 }
 0x294   :  { %v742_v14 = vmul.f32 %v741_v30, %v2359_v46  ;;  %v743_v16 = vmul.f32 %v740_v49, %v2362_v47 }
 0x295   :  { %v745_v19 = vpop.permute.xlu1 %744 }
 0x296   :  { %v1789_v21 = vpack.c.bf16 %v742_v14, %v734_v62  ;;  %v747_v38 = vpop.permute.xlu0 %746  ;;  %v1787_v53 = vpack.c.bf16 %v743_v16, %v735_v41  ;;  %v3202_v62 = vld [vmem:[#allocation2_spill] sm:$0xff] }
 0x297   :  { %v748_v56 = vsel %vm522_vm11, %v745_v19, %v747_v38  ;;  %v749_v61 = vsel %vm522_vm11, %v747_v38, %v745_v19  ;;  %vm3206_vm11 = vcmp.lt.s32.totalorder %v2193_v48, 48 }
 0x298   :  { %1788 = vmatprep.subr.bf16.mxu1 %v1787_v53  ;;  %v750_v47 = vmul.f32 %v749_v61, %v2386_v10  ;;  %v751_v33 = vmul.f32 %v748_v56, %v2389_v1  ;;  %v3208_v61 = vld [vmem:[#allocation4_spill] sm:$0xff] }
 0x299   :  { %v753_v29 = vpop.permute.xlu1 %752  ;;  %1790 = vmatpush1.bf16.msra.mxu1 %v1789_v21 }
 0x29a   :  { %v755_v40 = vpop.permute.xlu0 %754 }
 0x29b   :  { %v756_v45 = vsel %vm542_vm12, %v753_v29, %v755_v40  ;;  %v757_v46 = vsel %vm542_vm12, %v755_v40, %v753_v29  ;;  %vm3207_vm12 = vmmov %vm3206_vm11  ;;  %v3209_v40 = vld [vmem:[#allocation5_spill] sm:$0xff] }
 0x29c   :  { %v758_v59 = vmul.f32 %v757_v46, %v2393_v12  ;;  %v759_v60 = vmul.f32 %v756_v45, %v2396_v13  ;;  %v3210_v46 = vld [vmem:[#allocation6_spill] sm:$0xff] }
 0x29d   :  { %v761_v39 = vpop.permute.xlu1 %760 }
 0x29e   :  { %v1793_v22 = vpack.c.bf16 %v758_v59, %v750_v47  ;;  %v763_v55 = vpop.permute.xlu0 %762  ;;  %v1791_v58 = vpack.c.bf16 %v759_v60, %v751_v33  ;;  %v3211_v33 = vld [vmem:[#allocation7_spill] sm:$0xff] }
 0x29f   :  { %v764_v28 = vsel %vm3194_vm0, %v761_v39, %v763_v55  ;;  %v765_v2 = vsel %vm3195_vm1, %v763_v55, %v761_v39  ;;  %vm3212_vm0 = vcmp.lt.s32.totalorder %v2193_v48, 45 }
 0x2a0   :  { %v766_v57 = vmul.f32 %v764_v28, %v2411_v32  ;;  %v767_v10 = vmul.f32 %v765_v2, %v2414_v36  ;;  %1792 = vmatprep.subr.bf16.mxu1 %v1791_v58  ;;  %vm3213_vm1 = vmmov %vm3212_vm0 }
 0x2a1   :  { %v769_v1 = vpop.permute.xlu1 %768  ;;  %1794 = vmatpush1.bf16.msra.mxu1 %v1793_v22 }
 0x2a2   :  { %v1797_v12 = vpack.c.bf16 %v766_v57, %v2775_v20  ;;  %v771_v13 = vpop.permute.xlu0 %770  ;;  %v1795_v54 = vpack.c.bf16 %v767_v10, %v2777_v42 }
 0x2a3   :  { %v772_v63 = vsel %vm3196_vm2, %v769_v1, %v771_v13  ;;  %v773_v51 = vsel %vm3197_vm3, %v771_v13, %v769_v1  ;;  %vm3214_vm2 = vcmp.lt.s32.totalorder %v2193_v48, 3 }
 0x2a4   :  { %1796 = vmatprep.subr.bf16.mxu1 %v1795_v54  ;;  %v774_v20 = vmul.f32 %v772_v63, %v2436_v7  ;;  %v775_v42 = vmul.f32 %v773_v51, %v2439_v8  ;;  %vm3215_vm3 = vmmov %vm3214_vm2  ;;  %v3217_v54 = vld [vmem:[#allocation9_spill] sm:$0xff]  ;;  %v3218_v51 = vld [vmem:[#allocation10_spill] sm:$0xff] }
 0x2a5   :  { %v777_v0 = vpop.permute.xlu1 %776  ;;  %1798 = vmatpush1.bf16.msra.mxu1 %v1797_v12  ;;  %v3216_v12 = vld [vmem:[#allocation8_spill] sm:$0xff] }
 0x2a6   :  { %v779_v32 = vpop.permute.xlu0 %778 }
 0x2a7   :  { %v780_v36 = vsel %vm3198_vm4, %v777_v0, %v779_v32  ;;  %v781_v3 = vsel %vm3199_vm5, %v779_v32, %v777_v0  ;;  %v3219_v32 = vld [vmem:[#allocation11_spill] sm:$0xff]  ;;  %vm3220_vm4 = vcmp.lt.s32.totalorder %v2193_v48, 125 }
 0x2a8   :  { %v782_v4 = vmul.f32 %v780_v36, %v2443_v9  ;;  %v783_v5 = vmul.f32 %v781_v3, %v2446_v26  ;;  %v3203_v9 = vld [vmem:[#allocation3_spill] sm:$0xff]  ;;  %v1713_v26 = vld [vmem:[%s3096_s3 + $0x18] sm:$0xff]  ;;  %vm3221_vm5 = vmmov %vm3220_vm4 }
 0x2a9   :  { %v785_v15 = vpop.permute.xlu1 %784 }
 0x2aa   :  { %v1801_v35 = vpack.c.bf16 %v782_v4, %v774_v20  ;;  %v787_v6 = vpop.permute.xlu0 %786  ;;  %v1799_v11 = vpack.c.bf16 %v783_v5, %v775_v42 }
 0x2ab   :  { %v789_v49 = vsel %vm3200_vm6, %v787_v6, %v785_v15  ;;  %v788_v30 = vsel %vm3201_vm7, %v785_v15, %v787_v6  ;;  %vm3224_vm6 = vcmp.lt.s32.totalorder %v2193_v48, 83 }
 0x2ac   :  { %v791_v41 = vmul.f32 %v789_v49, %v3202_v62  ;;  %1800 = vmatprep.subr.bf16.mxu1 %v1799_v11  ;;  %v790_v14 = vmul.f32 %v788_v30, %v3203_v9  ;;  %v3223_v11 = vld [vmem:[#allocation13_spill] sm:$0xff]  ;;  %vm3225_vm7 = vmmov %vm3224_vm6 }
 0x2ad   :  { %v1155_v7 = vpop.permute.xlu1 %1154  ;;  %1802 = vmatpush1.bf16.msra.mxu1 %v1801_v35  ;;  %v3222_v35 = vld [vmem:[#allocation12_spill] sm:$0xff] }
 0x2ae   :  { %817 = vmatprep.subr.mxu1 %v791_v41  ;;  %v1157_v8 = vpop.permute.xlu0 %1156 }
 0x2af   :  { %v1158_v16 = vsel %vm3204_vm8, %v1155_v7, %v1157_v8  ;;  %v1159_v19 = vsel %vm3205_vm10, %v1157_v8, %v1155_v7  ;;  %vm3226_vm8 = vcmp.lt.s32.totalorder %v2193_v48, 80 }
 0x2b0   :  { %v1160_v29 = vmul.f32 %v1159_v19, %v3208_v61  ;;  %v1161_v45 = vmul.f32 %v1158_v16, %v3209_v40  ;;  %vm3227_vm10 = vmmov %vm3226_vm8  ;;  %v3231_v61 = vld [vmem:[#allocation17_spill] sm:$0xff] }
 0x2b1   :  { %v1163_v21 = vpop.permute.xlu1 %1162  ;;  %818 = vmatpush1.msra.mxu1 %v790_v14 }
 0x2b2   :  { %v1165_v38 = vpop.permute.xlu0 %1164  ;;  %1714 = vmatmul.mubr.msk.f32.vlgmr.msra.gmra.mrb[0].mxu1 %vm213_vm9, %v1713_v26 }
 0x2b3   :  { %v1166_v53 = vsel %vm3206_vm11, %v1163_v21, %v1165_v38  ;;  %v1167_v56 = vsel %vm3207_vm12, %v1165_v38, %v1163_v21  ;;  %1291 = vmatprep.mubr.f32.mxu1 %v3180_v24  ;;  %v3229_v38 = vld [vmem:[#allocation15_spill] sm:$0xff]  ;;  %vm3232_vm11 = vcmp.lt.s32.totalorder %v2193_v48, 77 }
 0x2b4   :  { %v1168_v47 = vmul.f32 %v1167_v56, %v3210_v46  ;;  %v1169_v59 = vmul.f32 %v1166_v53, %v3211_v33  ;;  %v3230_v53 = vld [vmem:[#allocation16_spill] sm:$0xff]  ;;  %vm3233_vm12 = vmmov %vm3232_vm11 }
 0x2b5   :  { %v1171_v60 = vpop.permute.xlu1 %1170 }
 0x2b6   :  { %v1821_v39 = vpack.c.bf16 %v1168_v47, %v1160_v29  ;;  %v1173_v22 = vpop.permute.xlu0 %1172  ;;  %v1819_v55 = vpack.c.bf16 %v1169_v59, %v1161_v45 }
 0x2b7   :  { %v1174_v58 = vsel %vm3212_vm0, %v1171_v60, %v1173_v22  ;;  %v1175_v28 = vsel %vm3213_vm1, %v1173_v22, %v1171_v60  ;;  %v3234_v60 = vld [vmem:[#allocation18_spill] sm:$0xff]  ;;  %vm3236_vm0 = vcmp.lt.s32.totalorder %v2193_v48, 68 }
 0x2b8   :  { %1820 = vmatprep.subr.bf16.mxu1 %v1819_v55  ;;  %v1176_v13 = vmul.f32 %v1175_v28, %v3216_v12  ;;  %v1177_v63 = vmul.f32 %v1174_v58, %v3217_v54  ;;  %v3235_v58 = vld [vmem:[#allocation19_spill] sm:$0xff]  ;;  %vm3237_vm1 = vmmov %vm3236_vm0 }
 0x2b9   :  { %v1179_v2 = vpop.permute.xlu1 %1178  ;;  %1822 = vmatpush1.bf16.msra.mxu1 %v1821_v39 }
 0x2ba   :  { %v1181_v57 = vpop.permute.xlu0 %1180 }
 0x2bb   :  { %v1182_v10 = vsel %vm3214_vm2, %v1179_v2, %v1181_v57  ;;  %v1183_v1 = vsel %vm3215_vm3, %v1181_v57, %v1179_v2  ;;  %v1725_v2 = vld [vmem:[%s3096_s3 + $0x28] sm:$0xff]  ;;  %vm3238_vm2 = vcmp.lt.s32.totalorder %v2193_v48, 64 }
 0x2bc   :  { %v1184_v0 = vmul.f32 %v1183_v1, %v3218_v51  ;;  %v1185_v36 = vmul.f32 %v1182_v10, %v3219_v32  ;;  %vm3239_vm3 = vmmov %vm3238_vm2 }
 0x2bd   :  { %v1187_v3 = vpop.permute.xlu1 %1186 }
 0x2be   :  { %v1825_v20 = vpack.c.bf16 %v1184_v0, %v1176_v13  ;;  %v1189_v42 = vpop.permute.xlu0 %1188  ;;  %v1823_v4 = vpack.c.bf16 %v1185_v36, %v1177_v63  ;;  %v3240_v63 = vld [vmem:[#allocation20_spill] sm:$0xff]  ;;  %v3241_v0 = vld [vmem:[#allocation21_spill] sm:$0xff]  ;;  %v3242_v36 = vld [vmem:[#allocation22_spill] sm:$0xff] }
 0x2bf   :  { %v1190_v5 = vsel %vm3220_vm4, %v1187_v3, %v1189_v42  ;;  %v1191_v15 = vsel %vm3221_vm5, %v1189_v42, %v1187_v3 }
 0x2c0   :  { %v1192_v6 = vmul.f32 %v1190_v5, %v3222_v35  ;;  %v1193_v49 = vmul.f32 %v1191_v15, %v3223_v11  ;;  %1824 = vmatprep.subr.bf16.mxu1 %v1823_v4 }
 0x2c1   :  { %v1195_v30 = vpop.permute.xlu1 %1194  ;;  %1826 = vmatpush1.bf16.msra.mxu1 %v1825_v20  ;;  %v3243_v20 = vld [vmem:[#allocation23_spill] sm:$0xff] }
 0x2c2   :  { %v1829_v62 = vpack.c.bf16 %v1192_v6, %v2811_v25  ;;  %v1197_v41 = vpop.permute.xlu0 %1196  ;;  %v1827_v7 = vpack.c.bf16 %v1193_v49, %v2813_v17  ;;  %v3228_v25 = vld [vmem:[#allocation14_spill] sm:$0xff] }
 0x2c3   :  { %v1198_v8 = vsel %vm3224_vm6, %v1195_v30, %v1197_v41  ;;  %v1199_v9 = vsel %vm3225_vm7, %v1197_v41, %v1195_v30 }
 0x2c4   :  { %1828 = vmatprep.subr.bf16.mxu1 %v1827_v7  ;;  %v1200_v21 = vmul.f32 %v1198_v8, %v3228_v25  ;;  %v1201_v17 = vmul.f32 %v1199_v9, %v3229_v38  ;;  %v3244_v7 = vld [vmem:[#allocation24_spill] sm:$0xff] }
 0x2c5   :  { %v1203_v14 = vpop.permute.xlu1 %1202  ;;  %1830 = vmatpush1.bf16.msra.mxu1 %v1829_v62 }
 0x2c6   :  { %v1205_v26 = vpop.permute.xlu0 %1204 }
 0x2c7   :  { %v1206_v16 = vsel %vm3226_vm8, %v1203_v14, %v1205_v26  ;;  %v1207_v19 = vsel %vm3227_vm10, %v1205_v26, %v1203_v14  ;;  %v3245_v14 = vld [vmem:[#allocation25_spill] sm:$0xff] }
 0x2c8   :  { %v1208_v56 = vmul.f32 %v1206_v16, %v3230_v53  ;;  %v1209_v29 = vmul.f32 %v1207_v19, %v3231_v61 }
 0x2c9   :  { %v1211_v40 = vpop.permute.xlu1 %1210 }
 0x2ca   :  { %v1833_v45 = vpack.c.bf16 %v1208_v56, %v1200_v21  ;;  %v1213_v46 = vpop.permute.xlu0 %1212  ;;  %v1831_v47 = vpack.c.bf16 %v1209_v29, %v1201_v17 }
 0x2cb   :  { %v1215_v33 = vsel %vm3232_vm11, %v1213_v46, %v1211_v40  ;;  %v1214_v59 = vsel %vm3233_vm12, %v1211_v40, %v1213_v46 }
 0x2cc   :  { %v1217_v39 = vmul.f32 %v1215_v33, %v3234_v60  ;;  %1832 = vmatprep.subr.bf16.mxu1 %v1831_v47  ;;  %v1216_v28 = vmul.f32 %v1214_v59, %v3235_v58 }
 0x2cd   :  { %v1560_v22 = vpop.permute.xlu1 %1559  ;;  %1834 = vmatpush1.bf16.msra.mxu1 %v1833_v45 }
 0x2ce   :  { %1243 = vmatprep.subr.mxu1 %v1217_v39  ;;  %v1562_v55 = vpop.permute.xlu0 %1561 }
 0x2cf   :  { %v1563_v57 = vsel %vm3236_vm0, %v1560_v22, %v1562_v55  ;;  %v1564_v10 = vsel %vm3237_vm1, %v1562_v55, %v1560_v22 }
 0x2d0   :  { %v1565_v51 = vmul.f32 %v1564_v10, %v3240_v63  ;;  %v1566_v32 = vmul.f32 %v1563_v57, %v3241_v0  ;;  %v1599_v48 = vmul.f32 %v1563_v57, %v2716_v23  ;;  %v1955_v23 = vld [vmem:[%s3094_s0] sm:$0xff] }
 0x2d1   :  { %v1568_v1 = vpop.permute.xlu1 %1567  ;;  %1244 = vmatpush1.msra.mxu1 %v1216_v28 }
 0x2d2   :  { %v1570_v12 = vpop.permute.xlu0 %1569  ;;  %1726 = vmatmul.mubr.msk.f32.vlgmr.msra.gmra.mrb[0].mxu1 %vm213_vm9, %v1725_v2 }
 0x2d3   :  { %v1571_v13 = vsel %vm3238_vm2, %v1568_v1, %v1570_v12  ;;  %v1572_v54 = vsel %vm3239_vm3, %v1570_v12, %v1568_v1  ;;  %1678 = vmatprep.mubr.f32.mxu1 %v3180_v24 }
 0x2d4   :  { %v1573_v3 = vmul.f32 %v1572_v54, %v3242_v36  ;;  %v1574_v42 = vmul.f32 %v1571_v13, %v3243_v20  ;;  %v1602_v53 = vmul.f32 %v1572_v54, %v2682_v34  ;;  %v1601_v40 = vmul.f32 %v1571_v13, %v2706_v31 }
 0x2d5   :  { %v1576_v4 = vpop.permute.xlu1 %1575 }
 0x2d6   :  { %v1853_v5 = vpack.c.bf16 %v1573_v3, %v1565_v51  ;;  %v1578_v15 = vpop.permute.xlu0 %1577  ;;  %v1851_v35 = vpack.c.bf16 %v1574_v42, %v1566_v32  ;;  %v1865_v34 = vpack.c.bf16 %v1601_v40, %v1599_v48 }
 0x2d7   :  { %v1579_v6 = vsel %vm1374_vm13, %v1576_v4, %v1578_v15  ;;  %v1580_v11 = vsel %vm1374_vm13, %v1578_v15, %v1576_v4 }
 0x2d8   :  { %1852 = vmatprep.subr.bf16.mxu1 %v1851_v35  ;;  %v1581_v41 = vmul.f32 %v1580_v11, %v2662_v52  ;;  %v1582_v8 = vmul.f32 %v1579_v6, %v3244_v7 }
 0x2d9   :  { %v1584_v24 = vpop.permute.xlu1 %1583  ;;  %1854 = vmatpush1.bf16.msra.mxu1 %v1853_v5 }
 0x2da   :  { %v1586_v49 = vpop.permute.xlu0 %1585 }
 0x2db   :  { %v1587_v30 = vsel %vm1394_vm14, %v1584_v24, %v1586_v49  ;;  %v1588_v62 = vsel %vm1394_vm14, %v1586_v49, %v1584_v24 }
 0x2dc   :  { %v1589_v9 = vmul.f32 %v1588_v62, %v2669_v18  ;;  %v1590_v26 = vmul.f32 %v1587_v30, %v3245_v14  ;;  %v1600_v18 = vmul.f32 %v1564_v10, %v2703_v27  ;;  %v1737_v27 = vld [vmem:[%s3096_s3 + $0x38] sm:$0xff] }
 0x2dd   :  { %v1592_v16 = vpop.permute.xlu1 %1591 }
 0x2de   :  { %v1857_v19 = vpack.c.bf16 %v1589_v9, %v1581_v41  ;;  %v1594_v25 = vpop.permute.xlu0 %1593  ;;  %v1855_v21 = vpack.c.bf16 %v1590_v26, %v1582_v8  ;;  %v1863_v45 = vpack.c.bf16 %v1602_v53, %v1600_v18 }
 0x2df   :  { %v1595_v38 = vsel %vm1414_vm15, %v1592_v16, %v1594_v25  ;;  %v1596_v17 = vsel %vm1414_vm15, %v1594_v25, %v1592_v16 }
 0x2e0   :  { %v1597_v52 = vmul.f32 %v1595_v38, %v2693_v44  ;;  %v1598_v56 = vmul.f32 %v1596_v17, %v2696_v37  ;;  %1856 = vmatprep.subr.bf16.mxu1 %v1855_v21  ;;  %v3246_v44 = vld [vmem:[#allocation26_spill] sm:$0xff]  ;;  %v3247_v37 = vld [vmem:[#allocation27_spill] sm:$0xff] }
 0x2e1   :  { %1858 = vmatpush1.bf16.msra.mxu1 %v1857_v19  ;;  %v1604_v46 = vmul.f32 %v1580_v11, %v3246_v44  ;;  %v1603_v47 = vmul.f32 %v1579_v6, %v3247_v37 }
 0x2e2   :  { %v1861_v61 = vpack.c.bf16 %v1597_v52, %v2843_v43  ;;  %v1859_v29 = vpack.c.bf16 %v1598_v56, %v2847_v50  ;;  %v1956_v50 = vld [vmem:[%s3094_s0 + $0x8] sm:$0xff] }
 0x2e4   :  { %1860 = vmatprep.subr.bf16.mxu1 %v1859_v29 }
 0x2e5   :  { %1862 = vmatpush1.bf16.msra.mxu1 %v1861_v61 }
 0x2e6   :  { %1864 = vmatprep.subr.bf16.mxu1 %v1863_v45 }
 0x2e9   :  { %1866 = vmatpush1.bf16.msra.mxu1 %v1865_v34 }
 0x2ea   :  { %1630 = vmatprep.subr.mxu1 %v1604_v46 }
 0x2ed   :  { %1631 = vmatpush1.msra.mxu1 %v1603_v47 }
 0x2ee   :  { %1738 = vmatmul.mubr.msk.f32.vlgmr.msra.gmra.mrb[0].mxu1 %vm213_vm9, %v1737_v27  ;;  %v370_v31 = vpop.permute.xlu1 %369 }
 0x2ef   :  { %v1867_v43 = vadd.f32 %v1955_v23, %v370_v31  ;;  %v1872_v33 = vadd.f32 %v1956_v50, %v370_v31  ;;  %v796_v59 = vpop.permute.xlu0 %795 }
 0x2f1   :  { %v1868_v39 = vadd.f32 %v1867_v43, %v796_v59  ;;  %v1873_v22 = vadd.f32 %v1872_v33, %v796_v59 }
 0x2f3   :  { %v1222_v60 = vpop.permute.xlu1 %1221 }
 0x2f4   :  { %v1869_v55 = vadd.f32 %v1868_v39, %v1222_v60  ;;  %v1874_v28 = vadd.f32 %v1873_v22, %v1222_v60 }
 0x2f8   :  { %v1609_v58 = vpop.permute.xlu1 %1608 }
 0x2f9   :  { %v1870_v2 = vadd.f32 %v1869_v55, %v1609_v58  ;;  %v1875_v57 = vadd.f32 %v1874_v28, %v1609_v58 }
 0x3c1   :  { %v1680_v10 = vpop.f32.mrb[0].mxu1 }
 0x3c2   :  { %v1871_v1 = vadd.f32 %v1870_v2, %v1680_v10  ;;  %v1682_v12 = vpop.f32.mrb[1].mxu1 }
 0x3c3   :  { %v1876_v13 = vadd.f32 %v1875_v57, %v1682_v12 }
 0x3c4   :  { %1687 = vst [vmem:[%s3097_s4] sm:$0xff] %v1871_v1 }
 0x3c5   :  { %1688 = vst [vmem:[%s3097_s4 + $0x8] sm:$0xff] %v1876_v13 }

</bundles_post_ra>
